<compile_context>
chip_gen: v7x
topology: tpu7x:2x2x1
jax: 0.10.0
libtpu: 0.0.40
codegen_flags: <defaults>
</compile_context>

<pallas_src>
import jax
import jax.numpy as jnp
from jax import lax
from jax.experimental import pallas as pl
from jax.experimental.pallas import tpu as pltpu


def _round_up(x, m):
    return (x + m - 1) // m * m


# ----------------------------------------------------------------------------
# Packed-parameter layout: one (NROWS, 128) f32 buffer, every row start is a
# multiple of 8 so all in-kernel slices are sublane-aligned.
# ----------------------------------------------------------------------------
def _param_layout(K, FC1, FC2, OUT):
    KK = K * K
    assert KK * 8 + 2 <= 128, "tap-stacked conv weights must fit in 128 lanes"
    assert max(FC1, FC2, OUT) <= 128
    lay = dict(
        R_W1=0,                 # rows 0:8,  cols 0:KK*8   conv1 tap-stacked weight
        COL_B1=KK * 8,          # rows 0:8,  1 col         conv1 bias (padded to 8)
        COL_B2=KK * 8 + 1,      # rows 0:8,  1 col         conv2 bias (padded to 8)
        R_W2=8,                 # rows 8:16, cols 0:KK*8   conv2 tap-stacked weight
        R_WF2=16,               # (FC1, FC2)               fc2 weight (transposed)
    )
    lay["R_WF3"] = _round_up(lay["R_WF2"] + FC1, 8)       # (FC2, OUT) fc3 weight
    lay["R_BF1"] = _round_up(lay["R_WF3"] + FC2, 8)       # (1, FC1)
    lay["R_BF2"] = lay["R_BF1"] + 8                       # (1, FC2)
    lay["R_BF3"] = lay["R_BF2"] + 8                       # (1, OUT)
    lay["NROWS"] = lay["R_BF3"] + 8
    return lay


# ----------------------------------------------------------------------------
# One-time parameter repack (outside jit).  Returns (packed_small, wf1p).
# ----------------------------------------------------------------------------
def prepare_params(params, H, W):
    w1, b1, w2, b2, wf1, bf1, wf2, bf2, wf3, bf3 = params
    C1, Cin, K, _ = w1.shape
    C2 = w2.shape[0]
    FC1, FC2, OUT = wf1.shape[0], wf2.shape[0], wf3.shape[0]
    assert max(Cin, C1, C2) <= 8, "per-tap channel blocks assume <= 8 channels"
    KK = K * K
    H2, W2 = H - 2 * (K - 1), W - 2 * (K - 1)
    CH = _round_up((H2 - 1) * W + W2, 128)        # per-channel flatten stride
    lay = _param_layout(K, FC1, FC2, OUT)

    def stack_conv(w, cout, cin):
        # (cout, cin, K, K) -> (8, KK*8): row = out channel (zero-padded to 8),
        # col = tap*8 + in channel (each tap block zero-padded to 8 so the matching
        # activation copies in the kernel are 8-sublane aligned).
        wt = jnp.transpose(w, (0, 2, 3, 1))                            # (cout,K,K,cin)
        wt = jnp.pad(wt, ((0, 8 - cout), (0, 0), (0, 0), (0, 8 - cin)))
        return wt.reshape(8, KK * 8)

    w1s = stack_conv(w1, C1, Cin)
    w2s = stack_conv(w2, C2, C1)

    # fc1: PyTorch feature index c*H2*W2 + y*W2 + x ; kernel feature index
    # c*CH + y*W + x (row stride W, channel stride CH=256).  Scatter the columns
    # onto that layout, zeros at garbage/pad positions (they only ever multiply
    # finite garbage activations).
    f1 = wf1.reshape(FC1, C2, H2, W2)
    f1 = jnp.pad(f1, ((0, 0), (0, 0), (0, 0), (0, W - W2)))            # x: W2 -> W
    f1 = f1.reshape(FC1, C2, H2 * W)[:, :, :min(H2 * W, CH)]
    f1 = jnp.pad(f1, ((0, 0), (0, 0), (0, CH - f1.shape[2])))          # -> CH
    wf1p = f1.reshape(FC1, C2 * CH).T                                  # (C2*CH, FC1)

    P = jnp.zeros((lay["NROWS"], 128), jnp.float32)
    P = P.at[0:8, 0:KK * 8].set(w1s)
    P = P.at[0:8, lay["COL_B1"]].set(jnp.pad(b1, (0, 8 - C1)))
    P = P.at[0:8, lay["COL_B2"]].set(jnp.pad(b2, (0, 8 - C2)))
    P = P.at[lay["R_W2"]:lay["R_W2"] + 8, 0:KK * 8].set(w2s)
    P = P.at[lay["R_WF2"]:lay["R_WF2"] + FC1, 0:FC2].set(wf2.T)
    P = P.at[lay["R_WF3"]:lay["R_WF3"] + FC2, 0:OUT].set(wf3.T)
    P = P.at[lay["R_BF1"], 0:FC1].set(bf1)
    P = P.at[lay["R_BF2"], 0:FC2].set(bf2)
    P = P.at[lay["R_BF3"], 0:OUT].set(bf3)
    return P, wf1p


def _pick_batch_tile(N, per_sample_bytes, budget=8 * 1024 * 1024):
    """Largest batch tile that divides N, fits the scoped-VMEM budget, and (for
    N > 8) is a multiple of 8 so the output block stays sublane-aligned.  The
    budget is conservative for v7x (64 MiB/TC, ~half of v5e/v6e)."""
    if N <= 8:
        return N
    cap = max(8, min(N, (budget // max(per_sample_bytes, 1)) // 8 * 8))
    for tb in range(cap, 7, -8):
        if N % tb == 0:
            return tb
    return N


# ----------------------------------------------------------------------------
# Fused forward builder (shapes are static; returns a jitted callable)
# ----------------------------------------------------------------------------
def make_cnn_forward(N, Cin, H, W, C1, C2, K, FC1, FC2, OUT):
    assert max(Cin, C1, C2) <= 8
    KK = K * K
    SHIFT = (K - 1) * W + (K - 1)                 # flattened shift of the last tap
    D = _round_up(SHIFT, 128)                     # lane shrink per conv stage
    H2, W2 = H - 2 * (K - 1), W - 2 * (K - 1)
    CH = _round_up((H2 - 1) * W + W2, 128)        # per-channel flatten stride (256)
    # Per-sample lane stride: holds the raw image and keeps the last sample's
    # flatten window inside the (twice lane-shrunk) conv2 output.
    SS = _round_up(max(H * W, CH + 2 * D), 128)
    lay = _param_layout(K, FC1, FC2, OUT)

    per_sample_bytes = 4 * (SS * (2 * KK * 8 + 2 * 8 + 2 * 8) + C2 * CH)
    TB = _pick_batch_tile(N, per_sample_bytes)    # batch tile per grid step
    assert N % TB == 0
    grid = (N // TB,)

    LX = TB * SS                  # x lane width per tile
    L1 = LX - D                   # conv1 output / tap-stack width
    L2 = LX - 2 * D               # conv2 output / tap-stack width
    assert L2 >= (TB - 1) * SS + CH and L1 >= L2 + SHIFT and LX >= L1 + SHIFT

    def elu(z):                   # F.elu, alpha = 1.0
        return jnp.where(z > 0.0, z, jnp.exp(jnp.minimum(z, 0.0)) - 1.0)

    def kernel(x_ref, p_ref, wf1_ref, out_ref,
               stk1_ref, o1_ref, stk2_ref, o2_ref, h_ref):
        # ---- conv1 + ReLU: 9 sublane-aligned shifted copies -> ONE MXU dot ----
        for t in range(KK):
            s = (t // K) * W + (t % K)
            stk1_ref[t * 8:(t + 1) * 8, :] = x_ref[:, s:s + L1]
        acc1 = jnp.dot(p_ref[0:8, 0:KK * 8], stk1_ref[...],
                       preferred_element_type=jnp.float32)
        o1_ref[...] = jnp.maximum(
            acc1 + p_ref[0:8, lay["COL_B1"]:lay["COL_B1"] + 1], 0.0)

        # ---- conv2 + ReLU ------------------------------------------------------
        for t in range(KK):
            s = (t // K) * W + (t % K)
            stk2_ref[t * 8:(t + 1) * 8, :] = o1_ref[:, s:s + L2]
        acc2 = jnp.dot(p_ref[lay["R_W2"]:lay["R_W2"] + 8, 0:KK * 8], stk2_ref[...],
                       preferred_element_type=jnp.float32)
        o2_ref[...] = jnp.maximum(
            acc2 + p_ref[0:8, lay["COL_B2"]:lay["COL_B2"] + 1], 0.0)

        # ---- flatten: all src/dst lane offsets are multiples of 128 -> unmasked
        # full-vreg copies.  Garbage columns are finite and meet zero fc1 weights.
        # (For very large TB convert the sample loop to lax.fori_loop.)
        for n in range(TB):
            for c in range(C2):
                h_ref[n:n + 1, c * CH:(c + 1) * CH] = \
                    o2_ref[c:c + 1, n * SS:n * SS + CH]

        # ---- fc1 -> ELU -> fc2 -> ELU -> fc3: three MXU dots -------------------
        hv = h_ref[...]
        a1 = elu(jnp.dot(hv, wf1_ref[...], preferred_element_type=jnp.float32)
                 + p_ref[lay["R_BF1"]:lay["R_BF1"] + 1, 0:FC1])
        a2 = elu(jnp.dot(a1, p_ref[lay["R_WF2"]:lay["R_WF2"] + FC1, 0:FC2],
                         preferred_element_type=jnp.float32)
                 + p_ref[lay["R_BF2"]:lay["R_BF2"] + 1, 0:FC2])
        out_ref[...] = (
            jnp.dot(a2, p_ref[lay["R_WF3"]:lay["R_WF3"] + FC2, 0:OUT],
                    preferred_element_type=jnp.float32)
            + p_ref[lay["R_BF3"]:lay["R_BF3"] + 1, 0:OUT])

    scratch = [
        pltpu.VMEM((KK * 8, L1), jnp.float32),   # conv1 tap-stacked activations
        pltpu.VMEM((8, L1), jnp.float32),        # conv1 output (channels padded to 8)
        pltpu.VMEM((KK * 8, L2), jnp.float32),   # conv2 tap-stacked activations
        pltpu.VMEM((8, L2), jnp.float32),        # conv2 output
        pltpu.VMEM((TB, C2 * CH), jnp.float32),  # flattened FC input
    ]
    scratch_bytes = 4 * (KK * 8 * L1 + 8 * L1 + KK * 8 * L2 + 8 * L2 + TB * C2 * CH)
    # Explicit scoped-VMEM limit sized from the working set (generous floor),
    # well under v7x's 64 MiB/TC physical VMEM.
    vmem_limit = min(32 * 1024 * 1024, max(16 * 1024 * 1024, 4 * scratch_bytes))

    fused_call = pl.pallas_call(
        kernel,
        out_shape=jax.ShapeDtypeStruct((N, OUT), jnp.float32),
        grid=grid,
        in_specs=[
            pl.BlockSpec((8, LX), lambda i: (0, i)),              # batch tile of x
            pl.BlockSpec((lay["NROWS"], 128), lambda i: (0, 0)),  # packed small params
            pl.BlockSpec((C2 * CH, FC1), lambda i: (0, 0)),       # fc1 weight
        ],
        out_specs=pl.BlockSpec((TB, OUT), lambda i: (i, 0)),
        scratch_shapes=scratch,
        compiler_params=pltpu.CompilerParams(
            dimension_semantics=("parallel",),    # both TensorCores on v7x
            vmem_limit_bytes=vmem_limit),
    )

    @jax.jit
    def forward(x, packed_params, wf1p):
        # Relayout x to (channel-on-sublanes, per-sample 128-aligned lane chunks).
        # Cheap at small N; for large batches this could be folded into the
        # kernel (index_map / in-kernel DMA) to avoid the extra HBM round trip.
        xr = x.reshape(N, Cin, H * W)
        xr = jnp.pad(xr, ((0, 0), (0, 8 - Cin), (0, SS - H * W)))
        x2p = jnp.transpose(xr, (1, 0, 2)).reshape(8, N * SS)
        return fused_call(x2p, packed_params, wf1p)

    return forward


# ----------------------------------------------------------------------------
# Pure-JAX reference (PyTorch semantics) for the correctness check
# ----------------------------------------------------------------------------
def ref_forward(x, params):
    w1, b1, w2, b2, wf1, bf1, wf2, bf2, wf3, bf3 = params

    def conv(y, w, b):
        z = lax.conv_general_dilated(
            y, w, (1, 1), "VALID",
            dimension_numbers=("NCHW", "OIHW", "NCHW"),
            precision=lax.Precision.HIGHEST)
        return z + b[None, :, None, None]

    def elu(z):
        return jnp.where(z > 0.0, z, jnp.exp(jnp.minimum(z, 0.0)) - 1.0)

    h = jnp.maximum(conv(x, w1, b1), 0.0)
    h = jnp.maximum(conv(h, w2, b2), 0.0)
    h = h.reshape(h.shape[0], -1)
    h = elu(h @ wf1.T + bf1)
    h = elu(h @ wf2.T + bf2)
    return h @ wf3.T + bf3


if __name__ == "__main__":
    # Shapes consistent with CNN(16, 16, 4, 10, 3), batch = 2.
    N, Cin, H, W = 2, 4, 16, 16
    K = 3                                # conv_dim
    OUT = 10                             # output_dim
    C1, C2 = 3, 5                        # conv1/conv2 output channels
    FC1, FC2 = 30, 30                    # fc1/fc2 output dims
    dim_after_convs = C2 * (H - 2 * (K - 1)) ** 2     # 5 * 12^2 = 720

    key = jax.random.PRNGKey(0)
    keys = jax.random.split(key, 11)

    def init(k, shape, fan_in):
        return jax.random.normal(k, shape, jnp.float32) / jnp.sqrt(jnp.float32(fan_in))

    x = jax.random.normal(keys[0], (N, Cin, H, W), jnp.float32)
    w1 = init(keys[1], (C1, Cin, K, K), Cin * K * K)
    b1 = init(keys[2], (C1,), Cin * K * K)
    w2 = init(keys[3], (C2, C1, K, K), C1 * K * K)
    b2 = init(keys[4], (C2,), C1 * K * K)
    wf1 = init(keys[5], (FC1, dim_after_convs), dim_after_convs)   # PyTorch (out, in)
    bf1 = init(keys[6], (FC1,), dim_after_convs)
    wf2 = init(keys[7], (FC2, FC1), FC1)
    bf2 = init(keys[8], (FC2,), FC1)
    wf3 = init(keys[9], (OUT, FC2), FC2)
    bf3 = init(keys[10], (OUT,), FC2)

    params = (w1, b1, w2, b2, wf1, bf1, wf2, bf2, wf3, bf3)
    packed_params, wf1p = prepare_params(params, H, W)   # one-time repack, outside jit

    forward = make_cnn_forward(N, Cin, H, W, C1, C2, K, FC1, FC2, OUT)
    out = jax.block_until_ready(forward(x, packed_params, wf1p))
    assert out.shape == (N, OUT) and out.dtype == jnp.float32

    ref = jax.block_until_ready(ref_forward(x, params))
    assert bool(jnp.allclose(out, ref, atol=2e-2, rtol=2e-2)), "mismatch vs JAX reference"

    print("KERNEL_OK")
</pallas_src>

<mosaic_0001>
module attributes {stable_mosaic.version = 11 : i64} {
  func.func @kernel(%arg0: i32, %arg1: memref<8x1024xf32, #tpu.memory_space<vmem>>, %arg2: memref<104x128xf32, #tpu.memory_space<vmem>>, %arg3: memref<1280x30xf32, #tpu.memory_space<vmem>>, %arg4: memref<2x10xf32, #tpu.memory_space<vmem>>, %arg5: memref<72x896xf32, #tpu.memory_space<vmem>>, %arg6: memref<8x896xf32, #tpu.memory_space<vmem>>, %arg7: memref<72x768xf32, #tpu.memory_space<vmem>>, %arg8: memref<8x768xf32, #tpu.memory_space<vmem>>, %arg9: memref<2x1280xf32, #tpu.memory_space<vmem>>) attributes {dimension_semantics = [#tpu.dimension_semantics<parallel>], iteration_bounds = array<i64: 1>, scalar_prefetch = 0 : i64, scratch_operands = 5 : i64, tpu.core_type = #tpu.core_type<tc>, window_params = [{transform_indices = @transform_0, window_bounds = array<i64: 8, 1024>}, {pipeline_mode = #tpu.pipeline_mode<synchronous>, transform_indices = @transform_1, window_bounds = array<i64: 104, 128>}, {pipeline_mode = #tpu.pipeline_mode<synchronous>, transform_indices = @transform_2, window_bounds = array<i64: 1280, 30>}, {transform_indices = @transform_3, window_bounds = array<i64: 2, 10>}]} {
    %c0 = arith.constant 0 : index
    %c0_0 = arith.constant 0 : index
    %0 = vector.load %arg1[%c0, %c0_0] : memref<8x1024xf32, #tpu.memory_space<vmem>>, vector<8x896xf32>
    %c0_1 = arith.constant 0 : index
    %c0_2 = arith.constant 0 : index
    %1 = vector.load %arg5[%c0_1, %c0_2] : memref<72x896xf32, #tpu.memory_space<vmem>>, vector<8x896xf32>
    tpu.vector_store %arg5[%c0_1, %c0_2], %0 {strides = array<i32>} : memref<72x896xf32, #tpu.memory_space<vmem>>, vector<8x896xf32>,
    %c0_3 = arith.constant 0 : index
    %c1 = arith.constant 1 : index
    %2 = vector.load %arg1[%c0_3, %c1] : memref<8x1024xf32, #tpu.memory_space<vmem>>, vector<8x896xf32>
    %c8 = arith.constant 8 : index
    %c0_4 = arith.constant 0 : index
    %3 = vector.load %arg5[%c8, %c0_4] : memref<72x896xf32, #tpu.memory_space<vmem>>, vector<8x896xf32>
    tpu.vector_store %arg5[%c8, %c0_4], %2 {strides = array<i32>} : memref<72x896xf32, #tpu.memory_space<vmem>>, vector<8x896xf32>,
    %c0_5 = arith.constant 0 : index
    %c2 = arith.constant 2 : index
    %4 = vector.load %arg1[%c0_5, %c2] : memref<8x1024xf32, #tpu.memory_space<vmem>>, vector<8x896xf32>
    %c16 = arith.constant 16 : index
    %c0_6 = arith.constant 0 : index
    %5 = vector.load %arg5[%c16, %c0_6] : memref<72x896xf32, #tpu.memory_space<vmem>>, vector<8x896xf32>
    tpu.vector_store %arg5[%c16, %c0_6], %4 {strides = array<i32>} : memref<72x896xf32, #tpu.memory_space<vmem>>, vector<8x896xf32>,
    %c0_7 = arith.constant 0 : index
    %c16_8 = arith.constant 16 : index
    %6 = vector.load %arg1[%c0_7, %c16_8] : memref<8x1024xf32, #tpu.memory_space<vmem>>, vector<8x896xf32>
    %c24 = arith.constant 24 : index
    %c0_9 = arith.constant 0 : index
    %7 = vector.load %arg5[%c24, %c0_9] : memref<72x896xf32, #tpu.memory_space<vmem>>, vector<8x896xf32>
    tpu.vector_store %arg5[%c24, %c0_9], %6 {strides = array<i32>} : memref<72x896xf32, #tpu.memory_space<vmem>>, vector<8x896xf32>,
    %c0_10 = arith.constant 0 : index
    %c17 = arith.constant 17 : index
    %8 = vector.load %arg1[%c0_10, %c17] : memref<8x1024xf32, #tpu.memory_space<vmem>>, vector<8x896xf32>
    %c32 = arith.constant 32 : index
    %c0_11 = arith.constant 0 : index
    %9 = vector.load %arg5[%c32, %c0_11] : memref<72x896xf32, #tpu.memory_space<vmem>>, vector<8x896xf32>
    tpu.vector_store %arg5[%c32, %c0_11], %8 {strides = array<i32>} : memref<72x896xf32, #tpu.memory_space<vmem>>, vector<8x896xf32>,
    %c0_12 = arith.constant 0 : index
    %c18 = arith.constant 18 : index
    %10 = vector.load %arg1[%c0_12, %c18] : memref<8x1024xf32, #tpu.memory_space<vmem>>, vector<8x896xf32>
    %c40 = arith.constant 40 : index
    %c0_13 = arith.constant 0 : index
    %11 = vector.load %arg5[%c40, %c0_13] : memref<72x896xf32, #tpu.memory_space<vmem>>, vector<8x896xf32>
    tpu.vector_store %arg5[%c40, %c0_13], %10 {strides = array<i32>} : memref<72x896xf32, #tpu.memory_space<vmem>>, vector<8x896xf32>,
    %c0_14 = arith.constant 0 : index
    %c32_15 = arith.constant 32 : index
    %12 = vector.load %arg1[%c0_14, %c32_15] : memref<8x1024xf32, #tpu.memory_space<vmem>>, vector<8x896xf32>
    %c48 = arith.constant 48 : index
    %c0_16 = arith.constant 0 : index
    %13 = vector.load %arg5[%c48, %c0_16] : memref<72x896xf32, #tpu.memory_space<vmem>>, vector<8x896xf32>
    tpu.vector_store %arg5[%c48, %c0_16], %12 {strides = array<i32>} : memref<72x896xf32, #tpu.memory_space<vmem>>, vector<8x896xf32>,
    %c0_17 = arith.constant 0 : index
    %c33 = arith.constant 33 : index
    %14 = vector.load %arg1[%c0_17, %c33] : memref<8x1024xf32, #tpu.memory_space<vmem>>, vector<8x896xf32>
    %c56 = arith.constant 56 : index
    %c0_18 = arith.constant 0 : index
    %15 = vector.load %arg5[%c56, %c0_18] : memref<72x896xf32, #tpu.memory_space<vmem>>, vector<8x896xf32>
    tpu.vector_store %arg5[%c56, %c0_18], %14 {strides = array<i32>} : memref<72x896xf32, #tpu.memory_space<vmem>>, vector<8x896xf32>,
    %c0_19 = arith.constant 0 : index
    %c34 = arith.constant 34 : index
    %16 = vector.load %arg1[%c0_19, %c34] : memref<8x1024xf32, #tpu.memory_space<vmem>>, vector<8x896xf32>
    %c64 = arith.constant 64 : index
    %c0_20 = arith.constant 0 : index
    %17 = vector.load %arg5[%c64, %c0_20] : memref<72x896xf32, #tpu.memory_space<vmem>>, vector<8x896xf32>
    tpu.vector_store %arg5[%c64, %c0_20], %16 {strides = array<i32>} : memref<72x896xf32, #tpu.memory_space<vmem>>, vector<8x896xf32>,
    %c0_21 = arith.constant 0 : index
    %c0_22 = arith.constant 0 : index
    %18 = vector.load %arg2[%c0_21, %c0_22] : memref<104x128xf32, #tpu.memory_space<vmem>>, vector<8x72xf32>
    %c0_23 = arith.constant 0 : index
    %c0_24 = arith.constant 0 : index
    %19 = vector.load %arg5[%c0_23, %c0_24] : memref<72x896xf32, #tpu.memory_space<vmem>>, vector<72x896xf32>
    %cst = arith.constant dense<0.000000e+00> : vector<8x896xf32>
    %20 = tpu.matmul %18, %19, %cst {dimension_numbers = #tpu.dot_dimension_numbers<[1], [0], [0], [1], [0, 0, 1, 1], [], []>} : vector<8x72xf32>, vector<72x896xf32>, vector<8x896xf32> -> vector<8x896xf32>
    %c0_25 = arith.constant 0 : index
    %c72 = arith.constant 72 : index
    %21 = vector.load %arg2[%c0_25, %c72] : memref<104x128xf32, #tpu.memory_space<vmem>>, vector<8x1xf32>
    %22 = vector.broadcast %21 : vector<8x1xf32> to vector<8x896xf32>
    %23 = arith.addf %20, %22 : vector<8x896xf32>
    %cst_26 = arith.constant 0.000000e+00 : f32
    %24 = vector.broadcast %cst_26 : f32 to vector<8x896xf32>
    %25 = arith.maximumf %23, %24 : vector<8x896xf32>
    %c0_27 = arith.constant 0 : index
    %c0_28 = arith.constant 0 : index
    %26 = vector.load %arg6[%c0_27, %c0_28] : memref<8x896xf32, #tpu.memory_space<vmem>>, vector<8x896xf32>
    tpu.vector_store %arg6[%c0_27, %c0_28], %25 {strides = array<i32>} : memref<8x896xf32, #tpu.memory_space<vmem>>, vector<8x896xf32>,
    %c0_29 = arith.constant 0 : index
    %c0_30 = arith.constant 0 : index
    %27 = vector.load %arg6[%c0_29, %c0_30] : memref<8x896xf32, #tpu.memory_space<vmem>>, vector<8x768xf32>
    %c0_31 = arith.constant 0 : index
    %c0_32 = arith.constant 0 : index
    %28 = vector.load %arg7[%c0_31, %c0_32] : memref<72x768xf32, #tpu.memory_space<vmem>>, vector<8x768xf32>
    tpu.vector_store %arg7[%c0_31, %c0_32], %27 {strides = array<i32>} : memref<72x768xf32, #tpu.memory_space<vmem>>, vector<8x768xf32>,
    %c0_33 = arith.constant 0 : index
    %c1_34 = arith.constant 1 : index
    %29 = vector.load %arg6[%c0_33, %c1_34] : memref<8x896xf32, #tpu.memory_space<vmem>>, vector<8x768xf32>
    %c8_35 = arith.constant 8 : index
    %c0_36 = arith.constant 0 : index
    %30 = vector.load %arg7[%c8_35, %c0_36] : memref<72x768xf32, #tpu.memory_space<vmem>>, vector<8x768xf32>
    tpu.vector_store %arg7[%c8_35, %c0_36], %29 {strides = array<i32>} : memref<72x768xf32, #tpu.memory_space<vmem>>, vector<8x768xf32>,
    %c0_37 = arith.constant 0 : index
    %c2_38 = arith.constant 2 : index
    %31 = vector.load %arg6[%c0_37, %c2_38] : memref<8x896xf32, #tpu.memory_space<vmem>>, vector<8x768xf32>
    %c16_39 = arith.constant 16 : index
    %c0_40 = arith.constant 0 : index
    %32 = vector.load %arg7[%c16_39, %c0_40] : memref<72x768xf32, #tpu.memory_space<vmem>>, vector<8x768xf32>
    tpu.vector_store %arg7[%c16_39, %c0_40], %31 {strides = array<i32>} : memref<72x768xf32, #tpu.memory_space<vmem>>, vector<8x768xf32>,
    %c0_41 = arith.constant 0 : index
    %c16_42 = arith.constant 16 : index
    %33 = vector.load %arg6[%c0_41, %c16_42] : memref<8x896xf32, #tpu.memory_space<vmem>>, vector<8x768xf32>
    %c24_43 = arith.constant 24 : index
    %c0_44 = arith.constant 0 : index
    %34 = vector.load %arg7[%c24_43, %c0_44] : memref<72x768xf32, #tpu.memory_space<vmem>>, vector<8x768xf32>
    tpu.vector_store %arg7[%c24_43, %c0_44], %33 {strides = array<i32>} : memref<72x768xf32, #tpu.memory_space<vmem>>, vector<8x768xf32>,
    %c0_45 = arith.constant 0 : index
    %c17_46 = arith.constant 17 : index
    %35 = vector.load %arg6[%c0_45, %c17_46] : memref<8x896xf32, #tpu.memory_space<vmem>>, vector<8x768xf32>
    %c32_47 = arith.constant 32 : index
    %c0_48 = arith.constant 0 : index
    %36 = vector.load %arg7[%c32_47, %c0_48] : memref<72x768xf32, #tpu.memory_space<vmem>>, vector<8x768xf32>
    tpu.vector_store %arg7[%c32_47, %c0_48], %35 {strides = array<i32>} : memref<72x768xf32, #tpu.memory_space<vmem>>, vector<8x768xf32>,
    %c0_49 = arith.constant 0 : index
    %c18_50 = arith.constant 18 : index
    %37 = vector.load %arg6[%c0_49, %c18_50] : memref<8x896xf32, #tpu.memory_space<vmem>>, vector<8x768xf32>
    %c40_51 = arith.constant 40 : index
    %c0_52 = arith.constant 0 : index
    %38 = vector.load %arg7[%c40_51, %c0_52] : memref<72x768xf32, #tpu.memory_space<vmem>>, vector<8x768xf32>
    tpu.vector_store %arg7[%c40_51, %c0_52], %37 {strides = array<i32>} : memref<72x768xf32, #tpu.memory_space<vmem>>, vector<8x768xf32>,
    %c0_53 = arith.constant 0 : index
    %c32_54 = arith.constant 32 : index
    %39 = vector.load %arg6[%c0_53, %c32_54] : memref<8x896xf32, #tpu.memory_space<vmem>>, vector<8x768xf32>
    %c48_55 = arith.constant 48 : index
    %c0_56 = arith.constant 0 : index
    %40 = vector.load %arg7[%c48_55, %c0_56] : memref<72x768xf32, #tpu.memory_space<vmem>>, vector<8x768xf32>
    tpu.vector_store %arg7[%c48_55, %c0_56], %39 {strides = array<i32>} : memref<72x768xf32, #tpu.memory_space<vmem>>, vector<8x768xf32>,
    %c0_57 = arith.constant 0 : index
    %c33_58 = arith.constant 33 : index
    %41 = vector.load %arg6[%c0_57, %c33_58] : memref<8x896xf32, #tpu.memory_space<vmem>>, vector<8x768xf32>
    %c56_59 = arith.constant 56 : index
    %c0_60 = arith.constant 0 : index
    %42 = vector.load %arg7[%c56_59, %c0_60] : memref<72x768xf32, #tpu.memory_space<vmem>>, vector<8x768xf32>
    tpu.vector_store %arg7[%c56_59, %c0_60], %41 {strides = array<i32>} : memref<72x768xf32, #tpu.memory_space<vmem>>, vector<8x768xf32>,
    %c0_61 = arith.constant 0 : index
    %c34_62 = arith.constant 34 : index
    %43 = vector.load %arg6[%c0_61, %c34_62] : memref<8x896xf32, #tpu.memory_space<vmem>>, vector<8x768xf32>
    %c64_63 = arith.constant 64 : index
    %c0_64 = arith.constant 0 : index
    %44 = vector.load %arg7[%c64_63, %c0_64] : memref<72x768xf32, #tpu.memory_space<vmem>>, vector<8x768xf32>
    tpu.vector_store %arg7[%c64_63, %c0_64], %43 {strides = array<i32>} : memref<72x768xf32, #tpu.memory_space<vmem>>, vector<8x768xf32>,
    %c8_65 = arith.constant 8 : index
    %c0_66 = arith.constant 0 : index
    %45 = vector.load %arg2[%c8_65, %c0_66] : memref<104x128xf32, #tpu.memory_space<vmem>>, vector<8x72xf32>
    %c0_67 = arith.constant 0 : index
    %c0_68 = arith.constant 0 : index
    %46 = vector.load %arg7[%c0_67, %c0_68] : memref<72x768xf32, #tpu.memory_space<vmem>>, vector<72x768xf32>
    %cst_69 = arith.constant dense<0.000000e+00> : vector<8x768xf32>
    %47 = tpu.matmul %45, %46, %cst_69 {dimension_numbers = #tpu.dot_dimension_numbers<[1], [0], [0], [1], [0, 0, 1, 1], [], []>} : vector<8x72xf32>, vector<72x768xf32>, vector<8x768xf32> -> vector<8x768xf32>
    %c0_70 = arith.constant 0 : index
    %c73 = arith.constant 73 : index
    %48 = vector.load %arg2[%c0_70, %c73] : memref<104x128xf32, #tpu.memory_space<vmem>>, vector<8x1xf32>
    %49 = vector.broadcast %48 : vector<8x1xf32> to vector<8x768xf32>
    %50 = arith.addf %47, %49 : vector<8x768xf32>
    %cst_71 = arith.constant 0.000000e+00 : f32
    %51 = vector.broadcast %cst_71 : f32 to vector<8x768xf32>
    %52 = arith.maximumf %50, %51 : vector<8x768xf32>
    %c0_72 = arith.constant 0 : index
    %c0_73 = arith.constant 0 : index
    %53 = vector.load %arg8[%c0_72, %c0_73] : memref<8x768xf32, #tpu.memory_space<vmem>>, vector<8x768xf32>
    tpu.vector_store %arg8[%c0_72, %c0_73], %52 {strides = array<i32>} : memref<8x768xf32, #tpu.memory_space<vmem>>, vector<8x768xf32>,
    %c0_74 = arith.constant 0 : index
    %c0_75 = arith.constant 0 : index
    %54 = vector.load %arg8[%c0_74, %c0_75] : memref<8x768xf32, #tpu.memory_space<vmem>>, vector<1x256xf32>
    %c0_76 = arith.constant 0 : index
    %c0_77 = arith.constant 0 : index
    %55 = vector.load %arg9[%c0_76, %c0_77] : memref<2x1280xf32, #tpu.memory_space<vmem>>, vector<1x256xf32>
    tpu.vector_store %arg9[%c0_76, %c0_77], %54 {strides = array<i32>} : memref<2x1280xf32, #tpu.memory_space<vmem>>, vector<1x256xf32>,
    %c1_78 = arith.constant 1 : index
    %c0_79 = arith.constant 0 : index
    %56 = vector.load %arg8[%c1_78, %c0_79] : memref<8x768xf32, #tpu.memory_space<vmem>>, vector<1x256xf32>
    %c0_80 = arith.constant 0 : index
    %c256 = arith.constant 256 : index
    %57 = vector.load %arg9[%c0_80, %c256] : memref<2x1280xf32, #tpu.memory_space<vmem>>, vector<1x256xf32>
    tpu.vector_store %arg9[%c0_80, %c256], %56 {strides = array<i32>} : memref<2x1280xf32, #tpu.memory_space<vmem>>, vector<1x256xf32>,
    %c2_81 = arith.constant 2 : index
    %c0_82 = arith.constant 0 : index
    %58 = vector.load %arg8[%c2_81, %c0_82] : memref<8x768xf32, #tpu.memory_space<vmem>>, vector<1x256xf32>
    %c0_83 = arith.constant 0 : index
    %c512 = arith.constant 512 : index
    %59 = vector.load %arg9[%c0_83, %c512] : memref<2x1280xf32, #tpu.memory_space<vmem>>, vector<1x256xf32>
    tpu.vector_store %arg9[%c0_83, %c512], %58 {strides = array<i32>} : memref<2x1280xf32, #tpu.memory_space<vmem>>, vector<1x256xf32>,
    %c3 = arith.constant 3 : index
    %c0_84 = arith.constant 0 : index
    %60 = vector.load %arg8[%c3, %c0_84] : memref<8x768xf32, #tpu.memory_space<vmem>>, vector<1x256xf32>
    %c0_85 = arith.constant 0 : index
    %c768 = arith.constant 768 : index
    %61 = vector.load %arg9[%c0_85, %c768] : memref<2x1280xf32, #tpu.memory_space<vmem>>, vector<1x256xf32>
    tpu.vector_store %arg9[%c0_85, %c768], %60 {strides = array<i32>} : memref<2x1280xf32, #tpu.memory_space<vmem>>, vector<1x256xf32>,
    %c4 = arith.constant 4 : index
    %c0_86 = arith.constant 0 : index
    %62 = vector.load %arg8[%c4, %c0_86] : memref<8x768xf32, #tpu.memory_space<vmem>>, vector<1x256xf32>
    %c0_87 = arith.constant 0 : index
    %c1024 = arith.constant 1024 : index
    %63 = vector.load %arg9[%c0_87, %c1024] : memref<2x1280xf32, #tpu.memory_space<vmem>>, vector<1x256xf32>
    tpu.vector_store %arg9[%c0_87, %c1024], %62 {strides = array<i32>} : memref<2x1280xf32, #tpu.memory_space<vmem>>, vector<1x256xf32>,
    %c0_88 = arith.constant 0 : index
    %c512_89 = arith.constant 512 : index
    %64 = vector.load %arg8[%c0_88, %c512_89] : memref<8x768xf32, #tpu.memory_space<vmem>>, vector<1x256xf32>
    %c1_90 = arith.constant 1 : index
    %c0_91 = arith.constant 0 : index
    %65 = vector.load %arg9[%c1_90, %c0_91] : memref<2x1280xf32, #tpu.memory_space<vmem>>, vector<1x256xf32>
    tpu.vector_store %arg9[%c1_90, %c0_91], %64 {strides = array<i32>} : memref<2x1280xf32, #tpu.memory_space<vmem>>, vector<1x256xf32>,
    %c1_92 = arith.constant 1 : index
    %c512_93 = arith.constant 512 : index
    %66 = vector.load %arg8[%c1_92, %c512_93] : memref<8x768xf32, #tpu.memory_space<vmem>>, vector<1x256xf32>
    %c1_94 = arith.constant 1 : index
    %c256_95 = arith.constant 256 : index
    %67 = vector.load %arg9[%c1_94, %c256_95] : memref<2x1280xf32, #tpu.memory_space<vmem>>, vector<1x256xf32>
    tpu.vector_store %arg9[%c1_94, %c256_95], %66 {strides = array<i32>} : memref<2x1280xf32, #tpu.memory_space<vmem>>, vector<1x256xf32>,
    %c2_96 = arith.constant 2 : index
    %c512_97 = arith.constant 512 : index
    %68 = vector.load %arg8[%c2_96, %c512_97] : memref<8x768xf32, #tpu.memory_space<vmem>>, vector<1x256xf32>
    %c1_98 = arith.constant 1 : index
    %c512_99 = arith.constant 512 : index
    %69 = vector.load %arg9[%c1_98, %c512_99] : memref<2x1280xf32, #tpu.memory_space<vmem>>, vector<1x256xf32>
    tpu.vector_store %arg9[%c1_98, %c512_99], %68 {strides = array<i32>} : memref<2x1280xf32, #tpu.memory_space<vmem>>, vector<1x256xf32>,
    %c3_100 = arith.constant 3 : index
    %c512_101 = arith.constant 512 : index
    %70 = vector.load %arg8[%c3_100, %c512_101] : memref<8x768xf32, #tpu.memory_space<vmem>>, vector<1x256xf32>
    %c1_102 = arith.constant 1 : index
    %c768_103 = arith.constant 768 : index
    %71 = vector.load %arg9[%c1_102, %c768_103] : memref<2x1280xf32, #tpu.memory_space<vmem>>, vector<1x256xf32>
    tpu.vector_store %arg9[%c1_102, %c768_103], %70 {strides = array<i32>} : memref<2x1280xf32, #tpu.memory_space<vmem>>, vector<1x256xf32>,
    %c4_104 = arith.constant 4 : index
    %c512_105 = arith.constant 512 : index
    %72 = vector.load %arg8[%c4_104, %c512_105] : memref<8x768xf32, #tpu.memory_space<vmem>>, vector<1x256xf32>
    %c1_106 = arith.constant 1 : index
    %c1024_107 = arith.constant 1024 : index
    %73 = vector.load %arg9[%c1_106, %c1024_107] : memref<2x1280xf32, #tpu.memory_space<vmem>>, vector<1x256xf32>
    tpu.vector_store %arg9[%c1_106, %c1024_107], %72 {strides = array<i32>} : memref<2x1280xf32, #tpu.memory_space<vmem>>, vector<1x256xf32>,
    %c0_108 = arith.constant 0 : index
    %c0_109 = arith.constant 0 : index
    %74 = vector.load %arg9[%c0_108, %c0_109] : memref<2x1280xf32, #tpu.memory_space<vmem>>, vector<2x1280xf32>
    %c0_110 = arith.constant 0 : index
    %c0_111 = arith.constant 0 : index
    %75 = vector.load %arg3[%c0_110, %c0_111] : memref<1280x30xf32, #tpu.memory_space<vmem>>, vector<1280x30xf32>
    %cst_112 = arith.constant dense<0.000000e+00> : vector<2x30xf32>
    %76 = tpu.matmul %74, %75, %cst_112 {dimension_numbers = #tpu.dot_dimension_numbers<[1], [0], [0], [1], [0, 0, 1, 1], [], []>} : vector<2x1280xf32>, vector<1280x30xf32>, vector<2x30xf32> -> vector<2x30xf32>
    %c80 = arith.constant 80 : index
    %c0_113 = arith.constant 0 : index
    %77 = vector.load %arg2[%c80, %c0_113] : memref<104x128xf32, #tpu.memory_space<vmem>>, vector<1x30xf32>
    %78 = vector.broadcast %77 : vector<1x30xf32> to vector<2x30xf32>
    %79 = arith.addf %76, %78 : vector<2x30xf32>
    %cst_114 = arith.constant 0.000000e+00 : f32
    %80 = vector.broadcast %cst_114 : f32 to vector<2x30xf32>
    %81 = arith.cmpf ogt, %79, %80 : vector<2x30xf32>
    %cst_115 = arith.constant 0.000000e+00 : f32
    %82 = vector.broadcast %cst_115 : f32 to vector<2x30xf32>
    %83 = arith.minimumf %79, %82 : vector<2x30xf32>
    %84 = math.exp %83 : vector<2x30xf32>
    %cst_116 = arith.constant 1.000000e+00 : f32
    %85 = vector.broadcast %cst_116 : f32 to vector<2x30xf32>
    %86 = arith.subf %84, %85 : vector<2x30xf32>
    %87 = arith.select %81, %79, %86 : vector<2x30xi1>, vector<2x30xf32>
    %c16_117 = arith.constant 16 : index
    %c0_118 = arith.constant 0 : index
    %88 = vector.load %arg2[%c16_117, %c0_118] : memref<104x128xf32, #tpu.memory_space<vmem>>, vector<30x30xf32>
    %cst_119 = arith.constant dense<0.000000e+00> : vector<2x30xf32>
    %89 = tpu.matmul %87, %88, %cst_119 {dimension_numbers = #tpu.dot_dimension_numbers<[1], [0], [0], [1], [0, 0, 1, 1], [], []>} : vector<2x30xf32>, vector<30x30xf32>, vector<2x30xf32> -> vector<2x30xf32>
    %c88 = arith.constant 88 : index
    %c0_120 = arith.constant 0 : index
    %90 = vector.load %arg2[%c88, %c0_120] : memref<104x128xf32, #tpu.memory_space<vmem>>, vector<1x30xf32>
    %91 = vector.broadcast %90 : vector<1x30xf32> to vector<2x30xf32>
    %92 = arith.addf %89, %91 : vector<2x30xf32>
    %cst_121 = arith.constant 0.000000e+00 : f32
    %93 = vector.broadcast %cst_121 : f32 to vector<2x30xf32>
    %94 = arith.cmpf ogt, %92, %93 : vector<2x30xf32>
    %cst_122 = arith.constant 0.000000e+00 : f32
    %95 = vector.broadcast %cst_122 : f32 to vector<2x30xf32>
    %96 = arith.minimumf %92, %95 : vector<2x30xf32>
    %97 = math.exp %96 : vector<2x30xf32>
    %cst_123 = arith.constant 1.000000e+00 : f32
    %98 = vector.broadcast %cst_123 : f32 to vector<2x30xf32>
    %99 = arith.subf %97, %98 : vector<2x30xf32>
    %100 = arith.select %94, %92, %99 : vector<2x30xi1>, vector<2x30xf32>
    %c48_124 = arith.constant 48 : index
    %c0_125 = arith.constant 0 : index
    %101 = vector.load %arg2[%c48_124, %c0_125] : memref<104x128xf32, #tpu.memory_space<vmem>>, vector<30x10xf32>
    %cst_126 = arith.constant dense<0.000000e+00> : vector<2x10xf32>
    %102 = tpu.matmul %100, %101, %cst_126 {dimension_numbers = #tpu.dot_dimension_numbers<[1], [0], [0], [1], [0, 0, 1, 1], [], []>} : vector<2x30xf32>, vector<30x10xf32>, vector<2x10xf32> -> vector<2x10xf32>
    %c96 = arith.constant 96 : index
    %c0_127 = arith.constant 0 : index
    %103 = vector.load %arg2[%c96, %c0_127] : memref<104x128xf32, #tpu.memory_space<vmem>>, vector<1x10xf32>
    %104 = vector.broadcast %103 : vector<1x10xf32> to vector<2x10xf32>
    %105 = arith.addf %102, %104 : vector<2x10xf32>
    %c0_128 = arith.constant 0 : index
    %c0_129 = arith.constant 0 : index
    %106 = vector.load %arg4[%c0_128, %c0_129] : memref<2x10xf32, #tpu.memory_space<vmem>>, vector<2x10xf32>
    tpu.vector_store %arg4[%c0_128, %c0_129], %105 {strides = array<i32>} : memref<2x10xf32, #tpu.memory_space<vmem>>, vector<2x10xf32>,
    return
  }
  func.func @transform_0(%arg0: i32) -> (i32, i32) {
    %c0_i32 = arith.constant 0 : i32
    %c0_i32_0 = arith.constant 0 : i32
    return %c0_i32, %arg0 : i32, i32
  }
  func.func @transform_1(%arg0: i32) -> (i32, i32) {
    %c0_i32 = arith.constant 0 : i32
    %c0_i32_0 = arith.constant 0 : i32
    %c0_i32_1 = arith.constant 0 : i32
    return %c0_i32, %c0_i32_0 : i32, i32
  }
  func.func @transform_2(%arg0: i32) -> (i32, i32) {
    %c0_i32 = arith.constant 0 : i32
    %c0_i32_0 = arith.constant 0 : i32
    %c0_i32_1 = arith.constant 0 : i32
    return %c0_i32, %c0_i32_0 : i32, i32
  }
  func.func @transform_3(%arg0: i32) -> (i32, i32) {
    %c0_i32 = arith.constant 0 : i32
    %c0_i32_0 = arith.constant 0 : i32
    return %arg0, %c0_i32 : i32, i32
  }
}

</mosaic_0001>

<bundles_post_ra>
// kernel: forward.1
= control target key start
LH: loop header
LB: loop body
LE: loop exit
PB: predicated region body
PF: predicated region fallthrough
CT: control target
= control target key end

     0   :  { %s3113_s24 = smov 127   ;;  %s4206_s0 = inlined_call_operand.vmem [shape: f32[8,1024], index: 0, kind: input, shape index: {}]   ;;  %s4207_s1 = inlined_call_operand.vmem [shape: f32[104,128], index: 1, kind: input, shape index: {}]   ;;  %s4208_s2 = inlined_call_operand.vmem [shape: f32[1280,30], index: 2, kind: input, shape index: {}]   ;;  %s4209_s3 = inlined_call_operand.hbm [shape: f32[2,10], index: 3, kind: output, shape index: {}]  }
   0x1   :  { %v3152_v0 = vld [vmem:[%s4206_s0 + $0x20] sm:$0xff]  ;;  %v3157_v1 = vld [vmem:[%s4206_s0 + $0x28] sm:$0xff]  ;;  %v3169_v4 = vld [vmem:[%s4206_s0 + $0x10] sm:$0xff] }
   0x2   :  { %v3162_v2 = vld [vmem:[%s4206_s0 + $0x8] sm:$0xff]  ;;  %v2877_v3 = vpack.i.bf16 %v3157_v1, %v3152_v0  ;;  %v3174_v5 = vld [vmem:[%s4206_s0] sm:$0xff]  ;;  %v3179_v6 = vld [vmem:[%s4206_s0 + $0x18] sm:$0xff] }
   0x3   :  { %v2867_v7 = vpack.i.bf16 %v3169_v4, %v3162_v2 }
   0x4   :  { %2878 = vrot.lane.b32.xlu1 %v2877_v3, %s3113_s24 }
   0x5   :  { %8 = vsyncpa [#allocation8], 0  ;;  %2868 = vrot.lane.b32.xlu0 %v2867_v7, %s3113_s24  ;;  %v2872_v8 = vpack.i.bf16 %v3179_v6, %v3174_v5  ;;  %s3114_s25 = smov 126   ;;  %s3115_s26 = smov 112   ;;  %v3207_v9 = vld [vmem:[%s4206_s0 + $0x30] sm:$0xff]  ;;  %v36_v10 = vld [vmem:[%s4206_s0 + $0x38] sm:$0xff] }
   0x6   :  { %s3116_s27 = smov 111   ;;  %s3117_s28 = smov 110   ;;  %v2957_v11 = vpack.i.bf16 %v36_v10, %v3207_v9  ;;  %v3120_v12 = vmov 0.0   ;;  %v2977_v13 = vpack.i.bf16 %v3207_v9, %v3157_v1  ;;  %v3122_v14 = vmov 72   ;;  %v3249_v15 = vld [vmem:[%s4207_s1] sm:$0xff] }
   0x7   :  { %s3118_s29 = smov 96   ;;  %s3119_s30 = smov 95   ;;  %597 = vmatprep.mubr.f32.mxu0 %v3120_v12  ;;  %668 = vmatprep.mubr.f32.mxu1 %v3120_v12  ;;  %vm61_vm0 = vcmask 1039360   ;;  %vm115_vm1 = vcmask 1031168   ;;  %vm169_vm2 = vcmask 916480   ;;  %vm223_vm3 = vcmask 908288  }
   0x8   :  { %2883 = vrot.lane.b32.xlu1 %v2867_v7, %s3114_s25  ;;  %s3121_s8 = smov 94   ;;  %vm277_vm4 = vcmask 900096   ;;  %vm331_vm5 = vcmask 785408   ;;  %vm385_vm6 = vcmask 777216   ;;  %vm439_vm7 = vcmask 769024   ;;  %s3128_s17 = smov [#allocation7]  }
   0x9   :  { %2873 = vrot.lane.b32.xlu0 %v2872_v8, %s3113_s24  ;;  %2992 = vset.pattern.permute.xlu1 %v3122_v14  ;;  %vm530_vm8 = vcmask 588800   ;;  %vm3124_vm9 = vmmov 0   ;;  %vm2133_vm11 = vcmask 1045504   ;;  %vm3127_vm12 = vmmov 1   ;;  %s2306_s18 = sshll.u32 %s3128_s17, 4  ;;  %s2307_s18 = int_to_ptr.vmem [resolvable:$true] %s2306_s18 }
   0xa   :  { %vm4159_vm13 = vmpackc.low %vm2133_vm11, %vm3127_vm12  ;;  %vm2129_vm14 = vcmask 244736   ;;  %s3089_s19 = scalar_lea.vmem %s2307_s18, 32  ;;  %p3094_p1 = scmp.lt.s32.totalorder %s2307_s18, %s2307_s18 }
   0xb   :  { %p3090_p0 = scmp.ne.s32.totalorder %s2307_s18, %s3089_s19  ;;  %p3095_p2 = scmp.lt.s32.totalorder %s3089_s19, %s3089_s19 }
   0xc   :  { %2893 = vrot.lane.b32.xlu1 %v2872_v8, %s3114_s25 }
   0xd   :  { %2888 = vrot.lane.b32.xlu0 %v2867_v7, %s3115_s26  ;;  %p3096_p3 = por %p3095_p2, %p3094_p1 }
   0xf   :  { %p3097_p4 = pnand %p3096_p3, %p3090_p0 }
  0x10   :  { %2903 = vrot.lane.b32.xlu1 %v2872_v8, %s3115_s26 }
  0x11   :  { %2898 = vrot.lane.b32.xlu0 %v2877_v3, %s3114_s25 }
  0x14   :  { %2913 = vrot.lane.b32.xlu1 %v2867_v7, %s3116_s27 }
  0x15   :  { %2908 = vrot.lane.b32.xlu0 %v2877_v3, %s3115_s26 }
  0x18   :  { %2923 = vrot.lane.b32.xlu1 %v2872_v8, %s3116_s27 }
  0x19   :  { %2918 = vrot.lane.b32.xlu0 %v2867_v7, %s3117_s28 }
  0x1c   :  { %2933 = vrot.lane.b32.xlu1 %v2872_v8, %s3117_s28 }
  0x1d   :  { %2928 = vrot.lane.b32.xlu0 %v2877_v3, %s3116_s27 }
  0x20   :  { %2938 = vrot.lane.b32.xlu1 %v2867_v7, %s3118_s29 }
  0x21   :  { %269 = vrot.lane.b32.xlu0 %v3152_v0, %s3117_s28 }
  0x24   :  { %2948 = vrot.lane.b32.xlu1 %v2872_v8, %s3118_s29 }
  0x25   :  { %2943 = vrot.lane.b32.xlu0 %v2867_v7, %s3119_s30 }
  0x28   :  { %2953 = vrot.lane.b32.xlu1 %v2872_v8, %s3119_s30 }
  0x29   :  { %323 = vrot.lane.b32.xlu0 %v3152_v0, %s3118_s29 }
  0x2c   :  { %2958 = vrot.lane.b32.xlu1 %v2957_v11, %s3113_s24 }
  0x2d   :  { %377 = vrot.lane.b32.xlu0 %v3152_v0, %s3119_s30 }
  0x30   :  { %427 = vrot.lane.b32.xlu1 %v3169_v4, %s3121_s8 }
  0x31   :  { %425 = vrot.lane.b32.xlu0 %v3162_v2, %s3121_s8 }
  0x34   :  { %429 = vrot.lane.b32.xlu1 %v3179_v6, %s3121_s8 }
  0x35   :  { %423 = vrot.lane.b32.xlu0 %v3174_v5, %s3121_s8 }
  0x38   :  { %2963 = vrot.lane.b32.xlu1 %v2957_v11, %s3114_s25 }
  0x39   :  { %431 = vrot.lane.b32.xlu0 %v3152_v0, %s3121_s8 }
  0x3c   :  { %2973 = vrot.lane.b32.xlu1 %v2957_v11, %s3116_s27 }
  0x3d   :  { %2968 = vrot.lane.b32.xlu0 %v2957_v11, %s3115_s26 }
  0x40   :  { %275 = vrot.lane.b32.xlu1 %v36_v10, %s3117_s28 }
  0x41   :  { %2978 = vrot.lane.b32.xlu0 %v2977_v13, %s3117_s28 }
  0x44   :  { %2988 = vrot.lane.b32.xlu1 %v2977_v13, %s3119_s30 }
  0x45   :  { %2983 = vrot.lane.b32.xlu0 %v2977_v13, %s3118_s29 }
  0x48   :  { %383 = vrot.lane.b32.xlu1 %v36_v10, %s3119_s30 }
  0x49   :  { %329 = vrot.lane.b32.xlu0 %v36_v10, %s3118_s29 }
  0x4c   :  { %435 = vrot.lane.b32.xlu1 %v3207_v9, %s3121_s8 }
  0x4d   :  { %433 = vrot.lane.b32.xlu0 %v3157_v1, %s3121_s8 }
  0x50   :  { %527 = vperm.xlu1 %2992, %v3249_v15  }
  0x51   :  { %437 = vrot.lane.b32.xlu0 %v36_v10, %s3121_s8 }
  0x76   :  { %v3253_v16 = vpop.permute.xlu1 %2878 }
  0x77   :  { %v2869_v17 = vpop.permute.xlu0 %2868  ;;  %v2880_v24 = vunpack.i.l.bf16 %v3253_v16 }
  0x78   :  { %v2871_v18 = vunpack.i.h.bf16 %v2869_v17  ;;  %v2870_v19 = vunpack.i.l.bf16 %v2869_v17 }
  0x7a   :  { %v2884_v20 = vpop.permute.xlu1 %2883  ;;  %v63_v21 = vsel %vm61_vm0, %v2870_v19, %v2871_v18 }
  0x7b   :  { %v2874_v22 = vpop.permute.xlu0 %2873  ;;  %v2569_v23 = vpack.c.bf16 %v63_v21, %v3162_v2  ;;  %v2886_v27 = vunpack.i.h.bf16 %v2884_v20  ;;  %v2885_v28 = vunpack.i.l.bf16 %v2884_v20 }
  0x7c   :  { %v2876_v25 = vunpack.i.h.bf16 %v2874_v22  ;;  %v2875_v26 = vunpack.i.l.bf16 %v2874_v22 }
  0x7d   :  { %2570 = vmatprep.subr.bf16.mxu0 %v2569_v23  ;;  %v117_v41 = vsel %vm115_vm1, %v2885_v28, %v2886_v27 }
  0x7e   :  { %v2894_v29 = vpop.permute.xlu1 %2893  ;;  %v62_v30 = vsel %vm61_vm0, %v2875_v26, %v2870_v19  ;;  %v65_v31 = vsel %vm61_vm0, %v2876_v25, %v2880_v24  ;;  %v64_v32 = vsel %vm61_vm0, %v2871_v18, %v2876_v25 }
  0x7f   :  { %v2889_v33 = vpop.permute.xlu0 %2888  ;;  %v2571_v34 = vpack.c.bf16 %v62_v30, %v3174_v5  ;;  %v2585_v35 = vpack.c.bf16 %v65_v31, %v3179_v6  ;;  %v2587_v38 = vpack.c.bf16 %v64_v32, %v3169_v4  ;;  %v2895_v39 = vunpack.i.l.bf16 %v2894_v29 }
  0x80   :  { %v2891_v36 = vunpack.i.h.bf16 %v2889_v33  ;;  %v2890_v37 = vunpack.i.l.bf16 %v2889_v33  ;;  %v2896_v52 = vunpack.i.h.bf16 %v2894_v29 }
  0x81   :  { %2572 = vmatpush1.bf16.msra.mxu0 %v2571_v34  ;;  %2586 = vmatprep.subr.bf16.mxu1 %v2585_v35  ;;  %v116_v47 = vsel %vm115_vm1, %v2895_v39, %v2885_v28 }
  0x82   :  { %2588 = vmatpush1.bf16.msra.mxu1 %v2587_v38  ;;  %v2904_v40 = vpop.permute.xlu1 %2903  ;;  %v171_v42 = vsel %vm169_vm2, %v2890_v37, %v2891_v36  ;;  %v118_v63 = vsel %vm115_vm1, %v2886_v27, %v2896_v52 }
  0x83   :  { %v2905_v43 = vunpack.i.l.bf16 %v2904_v40  ;;  %v3268_v44 = vpop.permute.xlu0 %2898  ;;  %v2573_v45 = vpack.c.bf16 %v171_v42, %v117_v41  ;;  %v2906_v46 = vunpack.i.h.bf16 %v2904_v40 }
  0x84   :  { %v2900_v49 = vunpack.i.l.bf16 %v3268_v44 }
  0x85   :  { %2574 = vmatprep.subr.bf16.mxu0 %v2573_v45  ;;  %v170_v48 = vsel %vm169_vm2, %v2905_v43, %v2890_v37  ;;  %v172_v55 = vsel %vm169_vm2, %v2891_v36, %v2906_v46 }
  0x86   :  { %v2914_v50 = vpop.permute.xlu1 %2913  ;;  %v2575_v51 = vpack.c.bf16 %v170_v48, %v116_v47  ;;  %v119_v59 = vsel %vm115_vm1, %v2896_v52, %v2900_v49  ;;  %v2591_v4 = vpack.c.bf16 %v172_v55, %v118_v63 }
  0x87   :  { %v3273_v53 = vpop.permute.xlu0 %2908  ;;  %v2916_v56 = vunpack.i.h.bf16 %v2914_v50  ;;  %v2915_v57 = vunpack.i.l.bf16 %v2914_v50 }
  0x88   :  { %v2910_v54 = vunpack.i.l.bf16 %v3273_v53  ;;  %2576 = vmatpush1.bf16.msra.mxu0 %v2575_v51 }
  0x89   :  { %v225_v7 = vsel %vm223_vm3, %v2915_v57, %v2916_v56 }
  0x8a   :  { %v2924_v58 = vpop.permute.xlu1 %2923  ;;  %v173_v60 = vsel %vm169_vm2, %v2906_v46, %v2910_v54 }
  0x8b   :  { %v2919_v61 = vpop.permute.xlu0 %2918  ;;  %v2589_v62 = vpack.c.bf16 %v173_v60, %v119_v59  ;;  %v2925_v5 = vunpack.i.l.bf16 %v2924_v58  ;;  %v2926_v18 = vunpack.i.h.bf16 %v2924_v58 }
  0x8c   :  { %v2921_v2 = vunpack.i.h.bf16 %v2919_v61  ;;  %v2920_v3 = vunpack.i.l.bf16 %v2919_v61  ;;  %v2881_v61 = vunpack.i.h.bf16 %v3253_v16 }
  0x8d   :  { %2590 = vmatprep.subr.bf16.mxu1 %v2589_v62  ;;  %v224_v19 = vsel %vm223_vm3, %v2925_v5, %v2915_v57  ;;  %v226_v29 = vsel %vm223_vm3, %v2916_v56, %v2926_v18 }
  0x8e   :  { %2592 = vmatpush1.bf16.msra.mxu1 %v2591_v4  ;;  %v2934_v6 = vpop.permute.xlu1 %2933  ;;  %v279_v8 = vsel %vm277_vm4, %v2920_v3, %v2921_v2  ;;  %v66_v5 = vsel %vm61_vm0, %v2880_v24, %v2881_v61 }
  0x8f   :  { %v2936_v10 = vunpack.i.h.bf16 %v2934_v6  ;;  %v2935_v11 = vunpack.i.l.bf16 %v2934_v6  ;;  %v3286_v13 = vpop.permute.xlu0 %2928  ;;  %v2577_v14 = vpack.c.bf16 %v279_v8, %v225_v7 }
  0x90   :  { %v2930_v17 = vunpack.i.l.bf16 %v3286_v13 }
  0x91   :  { %2578 = vmatprep.subr.bf16.mxu0 %v2577_v14  ;;  %v278_v20 = vsel %vm277_vm4, %v2935_v11, %v2920_v3  ;;  %v280_v25 = vsel %vm277_vm4, %v2921_v2, %v2936_v10  ;;  %v2603_v14 = vpack.c.bf16 %v66_v5, %v3152_v0 }
  0x92   :  { %v2939_v21 = vpop.permute.xlu1 %2938  ;;  %v2579_v22 = vpack.c.bf16 %v278_v20, %v224_v19  ;;  %v227_v26 = vsel %vm223_vm3, %v2926_v18, %v2930_v17  ;;  %v2595_v33 = vpack.c.bf16 %v280_v25, %v226_v29 }
  0x93   :  { %v3291_v23 = vpop.permute.xlu0 %269  ;;  %v2941_v30 = vunpack.i.h.bf16 %v2939_v21  ;;  %v2940_v31 = vunpack.i.l.bf16 %v2939_v21 }
  0x94   :  { %v281_v27 = vsel %vm277_vm4, %v2936_v10, %v3291_v23  ;;  %2580 = vmatpush1.bf16.msra.mxu0 %v2579_v22 }
  0x95   :  { %v2593_v28 = vpack.c.bf16 %v281_v27, %v227_v26  ;;  %v333_v39 = vsel %vm331_vm5, %v2940_v31, %v2941_v30  ;;  %v2901_v26 = vunpack.i.h.bf16 %v3268_v44 }
  0x96   :  { %v2949_v32 = vpop.permute.xlu1 %2948 }
  0x97   :  { %v2944_v34 = vpop.permute.xlu0 %2943  ;;  %2594 = vmatprep.subr.bf16.mxu1 %v2593_v28  ;;  %v2950_v37 = vunpack.i.l.bf16 %v2949_v32  ;;  %v2951_v46 = vunpack.i.h.bf16 %v2949_v32  ;;  %v3123_v28 = vmov 0.0|0.0  }
  0x98   :  { %v2946_v35 = vunpack.i.h.bf16 %v2944_v34  ;;  %v2945_v36 = vunpack.i.l.bf16 %v2944_v34  ;;  %2596 = vmatpush1.bf16.msra.mxu1 %v2595_v33 }
  0x99   :  { %v332_v47 = vsel %vm331_vm5, %v2950_v37, %v2940_v31  ;;  %v334_v60 = vsel %vm331_vm5, %v2941_v30, %v2951_v46  ;;  %v2931_v31 = vunpack.i.h.bf16 %v3286_v13 }
  0x9a   :  { %v2954_v38 = vpop.permute.xlu1 %2953  ;;  %v387_v40 = vsel %vm385_vm6, %v2945_v36, %v2946_v35 }
  0x9b   :  { %v2956_v41 = vunpack.i.h.bf16 %v2954_v38  ;;  %v2955_v42 = vunpack.i.l.bf16 %v2954_v38  ;;  %v3302_v43 = vpop.permute.xlu0 %323  ;;  %v2581_v45 = vpack.c.bf16 %v387_v40, %v333_v39 }
  0x9c   :  { %v335_v56 = vsel %vm331_vm5, %v2951_v46, %v3302_v43  ;;  %v228_v46 = vsel %vm223_vm3, %v2930_v17, %v2931_v31 }
  0x9d   :  { %2582 = vmatprep.subr.bf16.mxu0 %v2581_v45  ;;  %v386_v48 = vsel %vm385_vm6, %v2955_v42, %v2945_v36  ;;  %v388_v55 = vsel %vm385_vm6, %v2946_v35, %v2956_v41 }
  0x9e   :  { %v2959_v50 = vpop.permute.xlu1 %2958  ;;  %v2583_v51 = vpack.c.bf16 %v386_v48, %v332_v47  ;;  %v2599_v63 = vpack.c.bf16 %v388_v55, %v334_v60 }
  0x9f   :  { %v3306_v52 = vpop.permute.xlu0 %377  ;;  %v2960_v58 = vunpack.i.l.bf16 %v2959_v50  ;;  %v2961_v7 = vunpack.i.h.bf16 %v2959_v50 }
  0xa0   :  { %v389_v57 = vsel %vm385_vm6, %v2956_v41, %v3306_v52  ;;  %2584 = vmatpush1.bf16.msra.mxu0 %v2583_v51 }
  0xa1   :  { %v2597_v59 = vpack.c.bf16 %v389_v57, %v335_v56  ;;  %v67_v4 = vsel %vm61_vm0, %v2881_v61, %v2960_v58  ;;  %v68_v16 = vsel %vm61_vm0, %v2960_v58, %v2961_v7 }
  0xa2   :  { %v428_v62 = vpop.permute.xlu1 %427  ;;  %v2601_v11 = vpack.c.bf16 %v67_v4, %v3157_v1  ;;  %v2911_v1 = vunpack.i.h.bf16 %v3273_v53  ;;  %v2618_v20 = vpack.c.bf16 %v68_v16, %v3207_v9  ;;  %v120_v53 = vsel %vm115_vm1, %v2900_v49, %v2901_v26 }
  0xa3   :  { %v426_v2 = vpop.permute.xlu0 %425  ;;  %2598 = vmatprep.subr.bf16.mxu1 %v2597_v59 }
  0xa4   :  { %2600 = vmatpush1.bf16.msra.mxu1 %v2599_v63  ;;  %v441_v3 = vsel %vm439_vm7, %v426_v2, %v428_v62  ;;  %v174_v9 = vsel %vm169_vm2, %v2910_v54, %v2911_v1 }
  0xa5   :  { %549 = vmatprep.subr.mxu0 %v441_v3  ;;  %v2607_v41 = vpack.c.bf16 %v174_v9, %v120_v53 }
  0xa6   :  { %v430_v6 = vpop.permute.xlu1 %429 }
  0xa7   :  { %v424_v8 = vpop.permute.xlu0 %423  ;;  %v442_v0 = vsel %vm439_vm7, %v428_v62, %v430_v6 }
  0xa8   :  { %v440_v10 = vsel %vm439_vm7, %v424_v8, %v426_v2 }
  0xa9   :  { %550 = vmatpush1.msra.mxu0 %v440_v10 }
  0xaa   :  { %2314 = vmatmul.mubr.msk.f32.vlgmr.msra.gmra.mrb[0].mxu0 %vm530_vm8, %v3249_v15  ;;  %2602 = vmatprep.subr.bf16.mxu0 %v2601_v11  ;;  %v2964_v18 = vpop.permute.xlu1 %2963 }
  0xab   :  { %v3326_v19 = vpop.permute.xlu0 %431  ;;  %2604 = vmatpush1.bf16.msra.mxu0 %v2603_v14  ;;  %739 = vmatprep.mubr.f32.mxu0 %v3120_v12  ;;  %v2966_v21 = vunpack.i.h.bf16 %v2964_v18  ;;  %v2965_v22 = vunpack.i.l.bf16 %v2964_v18 }
  0xac   :  { %v443_v24 = vsel %vm439_vm7, %v430_v6, %v3326_v19 }
  0xad   :  { %620 = vmatprep.subr.mxu1 %v443_v24  ;;  %v122_v34 = vsel %vm115_vm1, %v2965_v22, %v2966_v21  ;;  %v121_v37 = vsel %vm115_vm1, %v2901_v26, %v2965_v22 }
  0xae   :  { %621 = vmatpush1.msra.mxu1 %v442_v0  ;;  %v2974_v25 = vpop.permute.xlu1 %2973 }
  0xaf   :  { %v2969_v27 = vpop.permute.xlu0 %2968  ;;  %2315 = vmatmul.mubr.msk.f32.vlgmr.msra.gmra.mrb[0].mxu1 %vm530_vm8, %v3249_v15  ;;  %2617 = vmatprep.subr.bf16.mxu1 %v3123_v28  ;;  %v2976_v32 = vunpack.i.h.bf16 %v2974_v25  ;;  %v2975_v33 = vunpack.i.l.bf16 %v2974_v25 }
  0xb0   :  { %v2971_v29 = vunpack.i.h.bf16 %v2969_v27  ;;  %v2970_v30 = vunpack.i.l.bf16 %v2969_v27  ;;  %2619 = vmatpush3.bf16.msra.mxu1 %v2618_v20  ;;  %2544 = vmatprep.mubr.msk.f32.mxu1 %vm3124_vm9, %v3120_v12 }
  0xb1   :  { %2620 = vmatprep.subr.bf16.mxu1 %v3123_v28  ;;  %v230_v47 = vsel %vm223_vm3, %v2975_v33, %v2976_v32  ;;  %v229_v48 = vsel %vm223_vm3, %v2931_v31, %v2975_v33 }
  0xb2   :  { %v176_v35 = vsel %vm169_vm2, %v2970_v30, %v2971_v29  ;;  %v276_v36 = vpop.permute.xlu1 %275  ;;  %v175_v38 = vsel %vm169_vm2, %v2911_v1, %v2970_v30 }
  0xb3   :  { %v2621_v54 = vpack.c.bf16 %v176_v35, %v122_v34  ;;  %v2979_v39 = vpop.permute.xlu0 %2978  ;;  %v2605_v40 = vpack.c.bf16 %v175_v38, %v121_v37 }
  0xb4   :  { %v2981_v42 = vunpack.i.h.bf16 %v2979_v39  ;;  %v2980_v45 = vunpack.i.l.bf16 %v2979_v39 }
  0xb5   :  { %2606 = vmatprep.subr.bf16.mxu0 %v2605_v40  ;;  %2622 = vmatpush3.bf16.msra.mxu1 %v2621_v54 }
  0xb6   :  { %v284_v44 = vsel %vm277_vm4, %v2981_v42, %v276_v36  ;;  %v282_v49 = vsel %vm277_vm4, %v3291_v23, %v2980_v45  ;;  %2608 = vmatpush1.bf16.msra.mxu0 %v2607_v41  ;;  %v2989_v50 = vpop.permute.xlu1 %2988  ;;  %2623 = vmatprep.subr.bf16.mxu1 %v3123_v28  ;;  %v283_v51 = vsel %vm277_vm4, %v2980_v45, %v2981_v42  ;;  %v3125_v42 = vmov 73  }
  0xb7   :  { %v2624_v13 = vpack.c.bf16 %v284_v44, %v230_v47  ;;  %v2611_v55 = vpack.c.bf16 %v282_v49, %v228_v46  ;;  %v2991_v17 = vunpack.i.h.bf16 %v2989_v50  ;;  %v2990_v56 = vunpack.i.l.bf16 %v2989_v50  ;;  %v2984_v57 = vpop.permute.xlu0 %2983  ;;  %3083 = vset.pattern.permute.xlu0 %v3125_v42 }
  0xb8   :  { %v2986_v58 = vunpack.i.h.bf16 %v2984_v57  ;;  %v2985_v59 = vunpack.i.l.bf16 %v2984_v57  ;;  %v2609_v60 = vpack.c.bf16 %v283_v51, %v229_v48 }
  0xb9   :  { %v390_v61 = vsel %vm385_vm6, %v3306_v52, %v2990_v56  ;;  %2625 = vmatpush3.bf16.msra.mxu1 %v2624_v13  ;;  %v391_v23 = vsel %vm385_vm6, %v2990_v56, %v2991_v17 }
  0xba   :  { %v336_v62 = vsel %vm331_vm5, %v3302_v43, %v2985_v59  ;;  %2610 = vmatprep.subr.bf16.mxu0 %v2609_v60  ;;  %v384_v63 = vpop.permute.xlu1 %383  ;;  %v337_v2 = vsel %vm331_vm5, %v2985_v59, %v2986_v58  ;;  %2626 = vmatprep.subr.bf16.mxu1 %v3123_v28 }
  0xbb   :  { %v2615_v3 = vpack.c.bf16 %v390_v61, %v336_v62  ;;  %2612 = vmatpush1.bf16.msra.mxu0 %v2611_v55  ;;  %v392_v4 = vsel %vm385_vm6, %v2991_v17, %v384_v63  ;;  %v330_v5 = vpop.permute.xlu0 %329  ;;  %v2613_v6 = vpack.c.bf16 %v391_v23, %v337_v2 }
  0xbc   :  { %v338_v52 = vsel %vm331_vm5, %v2986_v58, %v330_v5 }
  0xbd   :  { %v2627_v7 = vpack.c.bf16 %v392_v4, %v338_v52  ;;  %2614 = vmatprep.subr.bf16.mxu0 %v2613_v6 }
  0xbe   :  { %v436_v8 = vpop.permute.xlu1 %435 }
  0xbf   :  { %2616 = vmatpush1.bf16.msra.mxu0 %v2615_v3  ;;  %v434_v10 = vpop.permute.xlu0 %433  ;;  %2628 = vmatpush3.bf16.msra.mxu1 %v2627_v7 }
  0xc0   :  { %v444_v43 = vsel %vm439_vm7, %v3326_v19, %v434_v10  ;;  %v445_v11 = vsel %vm439_vm7, %v434_v10, %v436_v8  ;;  %2542 = vmatprep.subr.mxu1 %v3120_v12 }
  0xc1   :  { %691 = vmatprep.subr.mxu0 %v445_v11 }
  0xc3   :  { %692 = vmatpush1.msra.mxu0 %v444_v43  ;;  %v438_v14 = vpop.permute.xlu0 %437 }
  0xc4   :  { %v446_v18 = vsel %vm439_vm7, %v436_v8, %v438_v14  ;;  %2316 = vmatmul.mubr.msk.f32.vlgmr.msra.gmra.mrb[2].mxu0 %vm530_vm8, %v3249_v15 }
  0xc5   :  { %2543 = vmatpush3.msra.mxu1 %v446_v18  ;;  %1338 = vmatprep.mubr.f32.mxu0 %v3120_v12 }
  0xc6   :  { %2545 = vmatmul.mubr.msk.f32.vlgmr.msra.gmra.mrb[2].mxu1 %vm530_vm8, %v3249_v15 }
  0xc7   :  { %1409 = vmatprep.mubr.f32.mxu1 %v3120_v12 }
  0xcf   :  { %v528_v16 = vpop.permute.xlu1 %527 }
 0x17d   :  { %v599_v19 = vpop.f32.mrb[0].mxu0 }
 0x17e   :  { %v600_v24 = vadd.f32 %v599_v19, %v528_v16  ;;  %v601_v1 = vpop.f32.mrb[1].mxu0 }
 0x17f   :  { %v602_v0 = vadd.f32 %v601_v1, %v528_v16 }
 0x180   :  { %v3382_v20 = vmax.f32 %v600_v24, 0.0 }
 0x181   :  { %v3388_v22 = vmax.f32 %v602_v0, 0.0 }
 0x182   :  { %v670_v21 = vpop.f32.mrb[0].mxu1  ;;  %1040 = vrot.lane.b32.xlu1 %v3382_v20, %s3117_s28  ;;  %1086 = vrot.lane.b32.xlu0 %v3382_v20, %s3118_s29 }
 0x183   :  { %v671_v25 = vadd.f32 %v670_v21, %v528_v16  ;;  %v672_v26 = vpop.f32.mrb[1].mxu1 }
 0x184   :  { %v673_v40 = vadd.f32 %v672_v26, %v528_v16 }
 0x185   :  { %v3390_v27 = vmax.f32 %v671_v25, 0.0 }
 0x186   :  { %1132 = vrot.lane.b32.xlu1 %v3382_v20, %s3119_s30  ;;  %v3439_v41 = vmax.f32 %v673_v40, 0.0 }
 0x187   :  { %v2993_v29 = vpack.i.bf16 %v3390_v27, %v3388_v22 }
 0x189   :  { %2994 = vrot.lane.b32.xlu0 %v2993_v29, %s3113_s24 }
 0x18a   :  { %3004 = vrot.lane.b32.xlu1 %v2993_v29, %s3115_s26 }
 0x18d   :  { %2999 = vrot.lane.b32.xlu0 %v2993_v29, %s3114_s25 }
 0x18e   :  { %3014 = vrot.lane.b32.xlu1 %v2993_v29, %s3117_s28 }
 0x191   :  { %3009 = vrot.lane.b32.xlu0 %v2993_v29, %s3116_s27 }
 0x192   :  { %3024 = vrot.lane.b32.xlu1 %v2993_v29, %s3119_s30 }
 0x195   :  { %3019 = vrot.lane.b32.xlu0 %v2993_v29, %s3118_s29 }
 0x197   :  { %v741_v30 = vpop.f32.mrb[2].mxu0 }
 0x198   :  { %v742_v9 = vadd.f32 %v741_v30, %v528_v16  ;;  %v743_v31 = vpop.f32.mrb[3].mxu0 }
 0x199   :  { %v744_v32 = vadd.f32 %v743_v31, %v528_v16  ;;  %v812_v33 = vpop.f32.mrb[2].mxu1 }
 0x19a   :  { %v813_v34 = vadd.f32 %v812_v33, %v528_v16  ;;  %v2546_v35 = vpop.f32.mrb[3].mxu1  ;;  %v3405_v37 = vmax.f32 %v742_v9, 0.0 }
 0x19b   :  { %v3403_v36 = vmax.f32 %v744_v32, 0.0 }
 0x19c   :  { %v822_v38 = vmax.f32 %v813_v34, 0.0 }
 0x19d   :  { %v3033_v53 = vpack.i.bf16 %v3403_v36, %v3382_v20 }
 0x19e   :  { %v3028_v54 = vpack.i.bf16 %v3405_v37, %v822_v38  ;;  %v3068_v39 = vpack.i.bf16 %v822_v38, %v3403_v36 }
 0x19f   :  { %3034 = vrot.lane.b32.xlu1 %v3033_v53, %s3113_s24 }
 0x1a0   :  { %3029 = vrot.lane.b32.xlu0 %v3028_v54, %s3113_s24 }
 0x1a3   :  { %3044 = vrot.lane.b32.xlu1 %v3033_v53, %s3115_s26 }
 0x1a4   :  { %3039 = vrot.lane.b32.xlu0 %v3033_v53, %s3114_s25 }
 0x1a7   :  { %1180 = vrot.lane.b32.xlu1 %v3388_v22, %s3121_s8 }
 0x1a8   :  { %3049 = vrot.lane.b32.xlu0 %v3033_v53, %s3116_s27 }
 0x1ab   :  { %1178 = vrot.lane.b32.xlu1 %v3382_v20, %s3121_s8 }
 0x1ac   :  { %1182 = vrot.lane.b32.xlu0 %v3390_v27, %s3121_s8 }
 0x1af   :  { %3059 = vrot.lane.b32.xlu1 %v3028_v54, %s3115_s26 }
 0x1b0   :  { %3054 = vrot.lane.b32.xlu0 %v3028_v54, %s3114_s25 }
 0x1b3   :  { %1094 = vrot.lane.b32.xlu1 %v3405_v37, %s3118_s29 }
 0x1b4   :  { %3064 = vrot.lane.b32.xlu0 %v3028_v54, %s3116_s27 }
 0x1b7   :  { %3069 = vrot.lane.b32.xlu1 %v3068_v39, %s3117_s28 }
 0x1b8   :  { %1048 = vrot.lane.b32.xlu0 %v3405_v37, %s3117_s28 }
 0x1bb   :  { %3074 = vrot.lane.b32.xlu1 %v3068_v39, %s3118_s29 }
 0x1bc   :  { %3079 = vrot.lane.b32.xlu0 %v3068_v39, %s3119_s30 }
 0x1bf   :  { %1188 = vrot.lane.b32.xlu1 %v3403_v36, %s3121_s8 }
 0x1c0   :  { %1140 = vrot.lane.b32.xlu0 %v3405_v37, %s3119_s30 }
 0x1c3   :  { %1186 = vrot.lane.b32.xlu1 %v3405_v37, %s3121_s8 }
 0x1c4   :  { %1190 = vrot.lane.b32.xlu0 %v822_v38, %s3121_s8 }
 0x1c7   :  { %908 = vrot.lane.b32.xlu1 %v3439_v41, %s3114_s25 }
 0x1c8   :  { %862 = vrot.lane.b32.xlu0 %v3439_v41, %s3113_s24 }
 0x1cb   :  { %1000 = vrot.lane.b32.xlu1 %v3439_v41, %s3116_s27 }
 0x1cc   :  { %954 = vrot.lane.b32.xlu0 %v3439_v41, %s3115_s26 }
 0x1cf   :  { %1092 = vrot.lane.b32.xlu1 %v3439_v41, %s3118_s29 }
 0x1d0   :  { %1046 = vrot.lane.b32.xlu0 %v3439_v41, %s3117_s28 }
 0x1d3   :  { %1184 = vrot.lane.b32.xlu1 %v3439_v41, %s3121_s8 }
 0x1d4   :  { %1138 = vrot.lane.b32.xlu0 %v3439_v41, %s3119_s30 }
 0x1d8   :  { %1268 = vperm.xlu0 %3083, %v3249_v15  }
 0x1f4   :  { %v1041_v45 = vpop.permute.xlu1 %1040  ;;  %v1087_v46 = vpop.permute.xlu0 %1086 }
 0x1f8   :  { %v1133_v47 = vpop.permute.xlu1 %1132 }
 0x1fb   :  { %v3458_v48 = vpop.permute.xlu0 %2994 }
 0x1fc   :  { %v2997_v44 = vunpack.i.h.bf16 %v3458_v48  ;;  %v2996_v49 = vunpack.i.l.bf16 %v3458_v48  ;;  %v3466_v13 = vpop.permute.xlu1 %3004 }
 0x1fd   :  { %v3007_v58 = vunpack.i.h.bf16 %v3466_v13  ;;  %v3006_v59 = vunpack.i.l.bf16 %v3466_v13 }
 0x1fe   :  { %v871_v50 = vsel %vm61_vm0, %v2996_v49, %v2997_v44 }
 0x1ff   :  { %v2629_v51 = vpack.c.bf16 %v871_v50, %v3388_v22  ;;  %v3468_v55 = vpop.permute.xlu0 %2999  ;;  %v963_v3 = vsel %vm169_vm2, %v3006_v59, %v3007_v58 }
 0x200   :  { %v3470_v15 = vpop.permute.xlu1 %3014  ;;  %v3002_v60 = vunpack.i.h.bf16 %v3468_v55  ;;  %v3001_v61 = vunpack.i.l.bf16 %v3468_v55 }
 0x201   :  { %2630 = vmatprep.subr.bf16.mxu0 %v2629_v51  ;;  %v3017_v8 = vunpack.i.h.bf16 %v3470_v15  ;;  %v3016_v10 = vunpack.i.l.bf16 %v3470_v15 }
 0x202   :  { %v917_v2 = vsel %vm115_vm1, %v3001_v61, %v3002_v60 }
 0x203   :  { %v3472_v17 = vpop.permute.xlu0 %3009  ;;  %v2633_v14 = vpack.c.bf16 %v963_v3, %v917_v2  ;;  %v1055_v29 = vsel %vm277_vm4, %v3016_v10, %v3017_v8  ;;  %v1054_v32 = vsel %vm277_vm4, %v1041_v45, %v3016_v10  ;;  %v3549_v10 = vld [vmem:[%s4207_s1 + $0x8] sm:$0xff] }
 0x204   :  { %v3474_v56 = vpop.permute.xlu1 %3024  ;;  %v3012_v4 = vunpack.i.h.bf16 %v3472_v17  ;;  %v3011_v5 = vunpack.i.l.bf16 %v3472_v17 }
 0x205   :  { %v3027_v21 = vunpack.i.h.bf16 %v3474_v56  ;;  %v3026_v22 = vunpack.i.l.bf16 %v3474_v56  ;;  %v1560_v56 = vld [vmem:[%s4208_s2 + $0x80] sm:$0xff] }
 0x206   :  { %v1009_v24 = vsel %vm223_vm3, %v3011_v5, %v3012_v4 }
 0x207   :  { %v3476_v57 = vpop.permute.xlu0 %3019  ;;  %v2637_v9 = vpack.c.bf16 %v1055_v29, %v1009_v24  ;;  %v1147_v53 = vsel %vm385_vm6, %v3026_v22, %v3027_v21  ;;  %v1146_v42 = vsel %vm385_vm6, %v1133_v47, %v3026_v22 }
 0x208   :  { %v3022_v16 = vunpack.i.h.bf16 %v3476_v57  ;;  %v3021_v19 = vunpack.i.l.bf16 %v3476_v57 }
 0x20a   :  { %v1101_v31 = vsel %vm331_vm5, %v3021_v19, %v3022_v16  ;;  %v1100_v54 = vsel %vm331_vm5, %v1087_v46, %v3021_v19 }
 0x20b   :  { %v2641_v39 = vpack.c.bf16 %v1147_v53, %v1101_v31  ;;  %v2643_v50 = vpack.c.bf16 %v1146_v42, %v1100_v54 }
 0x211   :  { %v3035_v23 = vpop.permute.xlu1 %3034 }
 0x212   :  { %v3036_v62 = vunpack.i.l.bf16 %v3035_v23  ;;  %v3482_v63 = vpop.permute.xlu0 %3029  ;;  %v3037_v51 = vunpack.i.h.bf16 %v3035_v23 }
 0x213   :  { %v3031_v40 = vunpack.i.l.bf16 %v3482_v63  ;;  %v3032_v45 = vunpack.i.h.bf16 %v3482_v63 }
 0x214   :  { %v870_v6 = vsel %vm61_vm0, %v3036_v62, %v2996_v49 }
 0x215   :  { %v2631_v52 = vpack.c.bf16 %v870_v6, %v3382_v20  ;;  %v3494_v7 = vpop.permute.xlu1 %3044  ;;  %v875_v47 = vsel %vm61_vm0, %v3037_v51, %v3031_v40  ;;  %v874_v3 = vsel %vm61_vm0, %v3032_v45, %v3037_v51 }
 0x216   :  { %v3046_v43 = vunpack.i.l.bf16 %v3494_v7  ;;  %v3040_v11 = vpop.permute.xlu0 %3039  ;;  %v3047_v6 = vunpack.i.h.bf16 %v3494_v7  ;;  %v2663_v19 = vpack.c.bf16 %v874_v3, %v3405_v37 }
 0x217   :  { %v3041_v18 = vunpack.i.l.bf16 %v3040_v11  ;;  %2632 = vmatpush1.bf16.msra.mxu0 %v2631_v52  ;;  %v3042_v62 = vunpack.i.h.bf16 %v3040_v11 }
 0x218   :  { %2634 = vmatprep.subr.bf16.mxu0 %v2633_v14  ;;  %v962_v1 = vsel %vm169_vm2, %v3046_v43, %v3006_v59 }
 0x219   :  { %v916_v0 = vsel %vm115_vm1, %v3041_v18, %v3001_v61  ;;  %v1181_v20 = vpop.permute.xlu1 %1180  ;;  %v2661_v18 = vpack.c.bf16 %v875_v47, %v3403_v36 }
 0x21a   :  { %v2635_v25 = vpack.c.bf16 %v962_v1, %v916_v0  ;;  %v3508_v26 = vpop.permute.xlu0 %3049 }
 0x21b   :  { %v3051_v30 = vunpack.i.l.bf16 %v3508_v26  ;;  %v3052_v22 = vunpack.i.h.bf16 %v3508_v26 }
 0x21c   :  { %2636 = vmatpush1.bf16.msra.mxu0 %v2635_v25 }
 0x21d   :  { %v1008_v33 = vsel %vm223_vm3, %v3051_v30, %v3011_v5  ;;  %v1179_v34 = vpop.permute.xlu1 %1178  ;;  %2638 = vmatprep.subr.bf16.mxu0 %v2637_v9 }
 0x21e   :  { %v2639_v35 = vpack.c.bf16 %v1054_v32, %v1008_v33  ;;  %v3519_v38 = vpop.permute.xlu0 %1182  ;;  %v1192_v11 = vsel %vm439_vm7, %v1179_v34, %v1181_v20 }
 0x21f   :  { %v1193_v2 = vsel %vm439_vm7, %v1181_v20, %v3519_v38 }
 0x220   :  { %2640 = vmatpush1.bf16.msra.mxu0 %v2639_v35 }
 0x221   :  { %v3528_v49 = vpop.permute.xlu1 %3059  ;;  %2642 = vmatprep.subr.bf16.mxu0 %v2641_v39 }
 0x222   :  { %v3530_v59 = vpop.permute.xlu0 %3054  ;;  %v3061_v46 = vunpack.i.l.bf16 %v3528_v49  ;;  %v3062_v14 = vunpack.i.h.bf16 %v3528_v49 }
 0x223   :  { %v3056_v61 = vunpack.i.l.bf16 %v3530_v59  ;;  %v3057_v5 = vunpack.i.h.bf16 %v3530_v59 }
 0x224   :  { %2644 = vmatpush1.bf16.msra.mxu0 %v2643_v50  ;;  %v967_v7 = vsel %vm169_vm2, %v3047_v6, %v3061_v46  ;;  %v966_v29 = vsel %vm169_vm2, %v3062_v14, %v3047_v6 }
 0x225   :  { %v3541_v23 = vpop.permute.xlu1 %1094  ;;  %1290 = vmatprep.subr.mxu0 %v1193_v2  ;;  %v921_v43 = vsel %vm115_vm1, %v3042_v62, %v3056_v61  ;;  %v920_v1 = vsel %vm115_vm1, %v3057_v5, %v3042_v62 }
 0x226   :  { %v3544_v52 = vpop.permute.xlu0 %3064  ;;  %v2665_v20 = vpack.c.bf16 %v967_v7, %v921_v43  ;;  %v2667_v9 = vpack.c.bf16 %v966_v29, %v920_v1 }
 0x227   :  { %v3066_v24 = vunpack.i.l.bf16 %v3544_v52  ;;  %v3067_v30 = vunpack.i.h.bf16 %v3544_v52 }
 0x228   :  { %1291 = vmatpush1.msra.mxu0 %v1192_v11 }
 0x229   :  { %v3070_v0 = vpop.permute.xlu1 %3069  ;;  %2318 = vmatmul.mubr.msk.f32.vlgmr.msra.gmra.mrb[4].mxu0 %vm530_vm8, %v3549_v10  ;;  %2662 = vmatprep.subr.bf16.mxu0 %v2661_v18  ;;  %v1013_v31 = vsel %vm223_vm3, %v3052_v22, %v3066_v24  ;;  %v1012_v39 = vsel %vm223_vm3, %v3067_v30, %v3052_v22 }
 0x22a   :  { %v3072_v36 = vunpack.i.h.bf16 %v3070_v0  ;;  %v3071_v25 = vunpack.i.l.bf16 %v3070_v0  ;;  %v1049_v37 = vpop.permute.xlu0 %1048  ;;  %2664 = vmatpush1.bf16.msra.mxu0 %v2663_v19  ;;  %1480 = vmatprep.mubr.f32.mxu0 %v3120_v12 }
 0x22b   :  { %2666 = vmatprep.subr.bf16.mxu0 %v2665_v20 }
 0x22c   :  { %v1059_v32 = vsel %vm277_vm4, %v3071_v25, %v3072_v36  ;;  %v1058_v26 = vsel %vm277_vm4, %v1049_v37, %v3071_v25 }
 0x22d   :  { %v3075_v33 = vpop.permute.xlu1 %3074  ;;  %v2669_v34 = vpack.c.bf16 %v1059_v32, %v1013_v31  ;;  %v2671_v50 = vpack.c.bf16 %v1058_v26, %v1012_v39  ;;  %v1593_v32 = vld [vmem:[%s4208_s2 + $0x188] sm:$0xff]  ;;  %v1546_v39 = vld [vmem:[%s4208_s2 + $0x10] sm:$0xff] }
 0x22e   :  { %v3077_v35 = vunpack.i.h.bf16 %v3075_v33  ;;  %v3076_v53 = vunpack.i.l.bf16 %v3075_v33  ;;  %v3080_v54 = vpop.permute.xlu0 %3079  ;;  %2668 = vmatpush1.bf16.msra.mxu0 %v2667_v9  ;;  %v1576_v33 = vld [vmem:[%s4208_s2 + $0x100] sm:$0xff] }
 0x22f   :  { %v3082_v40 = vunpack.i.h.bf16 %v3080_v54  ;;  %v3081_v42 = vunpack.i.l.bf16 %v3080_v54  ;;  %2670 = vmatprep.subr.bf16.mxu0 %v2669_v34  ;;  %v1577_v34 = vld [vmem:[%s4208_s2 + $0x108] sm:$0xff]  ;;  %v1563_v54 = vld [vmem:[%s4208_s2 + $0x98] sm:$0xff] }
 0x230   :  { %v1105_v61 = vsel %vm331_vm5, %v3076_v53, %v3077_v35  ;;  %v1104_v47 = vsel %vm331_vm5, %v3541_v23, %v3076_v53  ;;  %v2711_v35 = vpack.c.bf16 %v1577_v34, %v1576_v33  ;;  %v1562_v53 = vld [vmem:[%s4208_s2 + $0x90] sm:$0xff]  ;;  %v1572_v33 = vld [vmem:[%s4208_s2 + $0xe0] sm:$0xff]  ;;  %v1573_v34 = vld [vmem:[%s4208_s2 + $0xe8] sm:$0xff] }
 0x231   :  { %v1189_v51 = vpop.permute.xlu1 %1188  ;;  %v1151_v62 = vsel %vm385_vm6, %v3081_v42, %v3082_v40  ;;  %v2681_v40 = vpack.c.bf16 %v1563_v54, %v1562_v53  ;;  %v2701_v53 = vpack.c.bf16 %v1573_v34, %v1572_v33  ;;  %v1556_v54 = vld [vmem:[%s4208_s2 + $0x60] sm:$0xff] }
 0x232   :  { %v1141_v46 = vpop.permute.xlu0 %1140  ;;  %2672 = vmatpush1.bf16.msra.mxu0 %v2671_v50  ;;  %v2673_v2 = vpack.c.bf16 %v1151_v62, %v1105_v61  ;;  %v1595_v61 = vld [vmem:[%s4208_s2 + $0x198] sm:$0xff]  ;;  %v1608_v34 = vld [vmem:[%s4208_s2 + $0x200] sm:$0xff] }
 0x233   :  { %v1150_v3 = vsel %vm385_vm6, %v1141_v46, %v3081_v42  ;;  %v1547_v42 = vld [vmem:[%s4208_s2 + $0x18] sm:$0xff] }
 0x234   :  { %v2675_v6 = vpack.c.bf16 %v1150_v3, %v1104_v47  ;;  %2674 = vmatprep.subr.bf16.mxu0 %v2673_v2  ;;  %v2683_v50 = vpack.c.bf16 %v1547_v42, %v1546_v39  ;;  %v1579_v2 = vld [vmem:[%s4208_s2 + $0x118] sm:$0xff]  ;;  %v1564_v3 = vld [vmem:[%s4208_s2 + $0xa0] sm:$0xff]  ;;  %v1557_v39 = vld [vmem:[%s4208_s2 + $0x68] sm:$0xff] }
 0x235   :  { %v1187_v52 = vpop.permute.xlu1 %1186  ;;  %v2703_v42 = vpack.c.bf16 %v1557_v39, %v1556_v54 }
 0x236   :  { %v1191_v43 = vpop.permute.xlu0 %1190  ;;  %2676 = vmatpush1.bf16.msra.mxu0 %v2675_v6  ;;  %v1196_v18 = vsel %vm439_vm7, %v1187_v52, %v1189_v51  ;;  %v1565_v6 = vld [vmem:[%s4208_s2 + $0xa8] sm:$0xff] }
 0x237   :  { %v1197_v11 = vsel %vm439_vm7, %v1189_v51, %v1191_v43  ;;  %v1594_v51 = vld [vmem:[%s4208_s2 + $0x190] sm:$0xff]  ;;  %v1548_v43 = vld [vmem:[%s4208_s2 + $0x20] sm:$0xff] }
 0x238   :  { %1432 = vmatprep.subr.mxu0 %v1197_v11  ;;  %v2713_v62 = vpack.c.bf16 %v1595_v61, %v1594_v51  ;;  %v1549_v11 = vld [vmem:[%s4208_s2 + $0x28] sm:$0xff]  ;;  %v1588_v61 = vld [vmem:[%s4208_s2 + $0x160] sm:$0xff] }
 0x239   :  { %v909_v19 = vpop.permute.xlu1 %908 }
 0x23a   :  { %v863_v24 = vpop.permute.xlu0 %862  ;;  %1433 = vmatpush1.msra.mxu0 %v1196_v18  ;;  %v918_v48 = vsel %vm115_vm1, %v3002_v60, %v909_v19  ;;  %v2687_v18 = vpack.c.bf16 %v1549_v11, %v1548_v43  ;;  %v1606_v11 = vld [vmem:[%s4208_s2 + $0x1f0] sm:$0xff] }
 0x23b   :  { %v872_v7 = vsel %vm61_vm0, %v2997_v44, %v863_v24  ;;  %v873_v1 = vsel %vm61_vm0, %v863_v24, %v3032_v45  ;;  %2320 = vmatmul.mubr.msk.f32.vlgmr.msra.gmra.mrb[6].mxu0 %vm530_vm8, %v3549_v10  ;;  %v919_v44 = vsel %vm115_vm1, %v909_v19, %v3057_v5  ;;  %v1596_v19 = vld [vmem:[%s4208_s2 + $0x1a0] sm:$0xff]  ;;  %v1597_v24 = vld [vmem:[%s4208_s2 + $0x1a8] sm:$0xff]  ;;  %vm2298_vm1 = vcmask 74752  }
 0x23c   :  { %v2645_v0 = vpack.c.bf16 %v873_v1, %v3439_v41  ;;  %v2647_v20 = vpack.c.bf16 %v872_v7, %v3390_v27  ;;  %v2717_v7 = vpack.c.bf16 %v1597_v24, %v1596_v19  ;;  %v1580_v1 = vld [vmem:[%s4208_s2 + $0x120] sm:$0xff]  ;;  %v1590_v24 = vld [vmem:[%s4208_s2 + $0x170] sm:$0xff] }
 0x23d   :  { %v1001_v22 = vpop.permute.xlu1 %1000 }
 0x23e   :  { %v955_v36 = vpop.permute.xlu0 %954  ;;  %2646 = vmatprep.subr.bf16.mxu1 %v2645_v0  ;;  %v1010_v55 = vsel %vm223_vm3, %v3012_v4, %v1001_v22  ;;  %v1011_v60 = vsel %vm223_vm3, %v1001_v22, %v3067_v30  ;;  %v1581_v0 = vld [vmem:[%s4208_s2 + $0x128] sm:$0xff]  ;;  %v1566_v22 = vld [vmem:[%s4208_s2 + $0xb0] sm:$0xff] }
 0x23f   :  { %v964_v63 = vsel %vm169_vm2, %v3007_v58, %v955_v36  ;;  %v965_v41 = vsel %vm169_vm2, %v955_v36, %v3062_v14  ;;  %2648 = vmatpush1.bf16.msra.mxu1 %v2647_v20  ;;  %v2719_v20 = vpack.c.bf16 %v1581_v0, %v1580_v1  ;;  %v1567_v36 = vld [vmem:[%s4208_s2 + $0xb8] sm:$0xff]  ;;  %v1624_v0 = vld [vmem:[%s4208_s2 + $0x280] sm:$0xff] }
 0x240   :  { %v2649_v27 = vpack.c.bf16 %v965_v41, %v919_v44  ;;  %v2651_v45 = vpack.c.bf16 %v964_v63, %v918_v48  ;;  %v2689_v48 = vpack.c.bf16 %v1567_v36, %v1566_v22  ;;  %v1550_v44 = vld [vmem:[%s4208_s2 + $0x30] sm:$0xff]  ;;  %v1551_v63 = vld [vmem:[%s4208_s2 + $0x38] sm:$0xff]  ;;  %v1656_v36 = vld [vmem:[%s4208_s2 + $0x380] sm:$0xff] }
 0x241   :  { %v1093_v25 = vpop.permute.xlu1 %1092  ;;  %v2691_v41 = vpack.c.bf16 %v1551_v63, %v1550_v44 }
 0x242   :  { %v1047_v29 = vpop.permute.xlu0 %1046  ;;  %2650 = vmatprep.subr.bf16.mxu1 %v2649_v27  ;;  %v1102_v14 = vsel %vm331_vm5, %v3022_v16, %v1093_v25  ;;  %v1103_v17 = vsel %vm331_vm5, %v1093_v25, %v3541_v23  ;;  %v1561_v16 = vld [vmem:[%s4208_s2 + $0x88] sm:$0xff]  ;;  %v1544_v23 = vld [vmem:[%s4208_s2] sm:$0xff]  ;;  %v1598_v27 = vld [vmem:[%s4208_s2 + $0x1b0] sm:$0xff] }
 0x243   :  { %v1056_v13 = vsel %vm277_vm4, %v3017_v8, %v1047_v29  ;;  %v1057_v58 = vsel %vm277_vm4, %v1047_v29, %v1049_v37  ;;  %2652 = vmatpush1.bf16.msra.mxu1 %v2651_v45  ;;  %v1599_v45 = vld [vmem:[%s4208_s2 + $0x1b8] sm:$0xff]  ;;  %v1582_v29 = vld [vmem:[%s4208_s2 + $0x130] sm:$0xff] }
 0x244   :  { %v2653_v49 = vpack.c.bf16 %v1057_v58, %v1011_v60  ;;  %v2655_v59 = vpack.c.bf16 %v1056_v13, %v1010_v55  ;;  %v2721_v25 = vpack.c.bf16 %v1599_v45, %v1598_v27  ;;  %v1583_v55 = vld [vmem:[%s4208_s2 + $0x138] sm:$0xff]  ;;  %v1568_v13 = vld [vmem:[%s4208_s2 + $0xc0] sm:$0xff]  ;;  %v1569_v58 = vld [vmem:[%s4208_s2 + $0xc8] sm:$0xff] }
 0x245   :  { %v1185_v8 = vpop.permute.xlu1 %1184  ;;  %v2723_v60 = vpack.c.bf16 %v1583_v55, %v1582_v29 }
 0x246   :  { %v1139_v5 = vpop.permute.xlu0 %1138  ;;  %2654 = vmatprep.subr.bf16.mxu1 %v2653_v49  ;;  %v1195_v9 = vsel %vm439_vm7, %v1185_v8, %v1187_v52  ;;  %v1194_v57 = vsel %vm439_vm7, %v3519_v38, %v1185_v8  ;;  %v1545_v38 = vld [vmem:[%s4208_s2 + $0x8] sm:$0xff]  ;;  %v2685_v52 = vpack.c.bf16 %v1565_v6, %v1564_v3  ;;  %v2693_v49 = vpack.c.bf16 %v1569_v58, %v1568_v13  ;;  %v1584_v8 = vld [vmem:[%s4208_s2 + $0x140] sm:$0xff]  ;;  %v1558_v6 = vld [vmem:[%s4208_s2 + $0x70] sm:$0xff] }
 0x247   :  { %v1148_v15 = vsel %vm385_vm6, %v3027_v21, %v1139_v5  ;;  %v1149_v4 = vsel %vm385_vm6, %v1139_v5, %v1141_v46  ;;  %2656 = vmatpush1.bf16.msra.mxu1 %v2655_v59  ;;  %v2677_v21 = vpack.c.bf16 %v1561_v16, %v1560_v56  ;;  %v2679_v31 = vpack.c.bf16 %v1545_v38, %v1544_v23  ;;  %v1578_v46 = vld [vmem:[%s4208_s2 + $0x110] sm:$0xff]  ;;  %v1552_v59 = vld [vmem:[%s4208_s2 + $0x40] sm:$0xff]  ;;  %v1553_v5 = vld [vmem:[%s4208_s2 + $0x48] sm:$0xff] }
 0x248   :  { %v2657_v37 = vpack.c.bf16 %v1149_v4, %v1103_v17  ;;  %v2659_v30 = vpack.c.bf16 %v1148_v15, %v1102_v14  ;;  %v2715_v47 = vpack.c.bf16 %v1579_v2, %v1578_v46  ;;  %v2695_v14 = vpack.c.bf16 %v1553_v5, %v1552_v59  ;;  %v1600_v17 = vld [vmem:[%s4208_s2 + $0x1c0] sm:$0xff]  ;;  %v1601_v15 = vld [vmem:[%s4208_s2 + $0x1c8] sm:$0xff]  ;;  %v1554_v16 = vld [vmem:[%s4208_s2 + $0x50] sm:$0xff] }
 0x249   :  { %v2725_v4 = vpack.c.bf16 %v1601_v15, %v1600_v17  ;;  %v1602_v38 = vld [vmem:[%s4208_s2 + $0x1d0] sm:$0xff]  ;;  %v1631_v13 = vld [vmem:[%s4208_s2 + $0x2b8] sm:$0xff] }
 0x24a   :  { %2658 = vmatprep.subr.bf16.mxu1 %v2657_v37  ;;  %v1585_v37 = vld [vmem:[%s4208_s2 + $0x148] sm:$0xff]  ;;  %v1574_v2 = vld [vmem:[%s4208_s2 + $0xf0] sm:$0xff] }
 0x24b   :  { %2660 = vmatpush1.bf16.msra.mxu1 %v2659_v30  ;;  %v2727_v30 = vpack.c.bf16 %v1585_v37, %v1584_v8 }
 0x24c   :  { %1361 = vmatprep.subr.mxu1 %v1195_v9  ;;  %v1570_v9 = vld [vmem:[%s4208_s2 + $0xd0] sm:$0xff] }
 0x24f   :  { %1362 = vmatpush1.msra.mxu1 %v1194_v57  ;;  %v1571_v57 = vld [vmem:[%s4208_s2 + $0xd8] sm:$0xff] }
 0x250   :  { %2319 = vmatmul.mubr.msk.f32.vlgmr.msra.gmra.mrb[4].mxu1 %vm530_vm8, %v3549_v10  ;;  %v1592_v10 = vld [vmem:[%s4208_s2 + $0x180] sm:$0xff]  ;;  %2678 = vmatprep.subr.bf16.mxu1 %v2677_v21  ;;  %v2697_v56 = vpack.c.bf16 %v1571_v57, %v1570_v9  ;;  %v1555_v21 = vld [vmem:[%s4208_s2 + $0x58] sm:$0xff]  ;;  %v3126_v9 = vmov 1983009808  }
 0x251   :  { %v2709_v26 = vpack.c.bf16 %v1593_v32, %v1592_v10  ;;  %2680 = vmatpush3.bf16.msra.mxu1 %v2679_v31  ;;  %v2699_v23 = vpack.c.bf16 %v1555_v21, %v1554_v16  ;;  %v1603_v31 = vld [vmem:[%s4208_s2 + $0x1d8] sm:$0xff]  ;;  %v1586_v10 = vld [vmem:[%s4208_s2 + $0x150] sm:$0xff]  ;;  %v1714_v57 = vunpack.c.l.s4 %v3126_v9  ;;  %v1633_v9 = vld [vmem:[%s4208_s2 + $0x2c8] sm:$0xff] }
 0x252   :  { %2682 = vmatprep.subr.bf16.mxu1 %v2681_v40  ;;  %v2729_v32 = vpack.c.bf16 %v1603_v31, %v1602_v38  ;;  %v1604_v40 = vld [vmem:[%s4208_s2 + $0x1e0] sm:$0xff] }
 0x253   :  { %2710 = vmatprep.subr.bf16.mxu0 %v2709_v26  ;;  %v1587_v26 = vld [vmem:[%s4208_s2 + $0x158] sm:$0xff]  ;;  %v1715_v31 = vunpack.c.0.s8 %v1714_v57 }
 0x254   :  { %2712 = vmatpush3.bf16.msra.mxu0 %v2711_v35  ;;  %v2731_v35 = vpack.c.bf16 %v1587_v26, %v1586_v10 }
 0x255   :  { %2684 = vmatpush3.bf16.msra.mxu1 %v2683_v50  ;;  %2714 = vmatprep.subr.bf16.mxu0 %v2713_v62  ;;  %v1605_v50 = vld [vmem:[%s4208_s2 + $0x1e8] sm:$0xff] }
 0x256   :  { %2686 = vmatprep.subr.bf16.mxu1 %v2685_v52  ;;  %v2733_v51 = vpack.c.bf16 %v1605_v50, %v1604_v40  ;;  %v1589_v62 = vld [vmem:[%s4208_s2 + $0x168] sm:$0xff]  ;;  %v1559_v52 = vld [vmem:[%s4208_s2 + $0x78] sm:$0xff] }
 0x257   :  { %v2735_v46 = vpack.c.bf16 %v1589_v62, %v1588_v61  ;;  %v2707_v43 = vpack.c.bf16 %v1559_v52, %v1558_v6  ;;  %v1269_v63 = vpop.permute.xlu0 %1268  ;;  %v1626_v61 = vld [vmem:[%s4208_s2 + $0x290] sm:$0xff]  ;;  %v1627_v62 = vld [vmem:[%s4208_s2 + $0x298] sm:$0xff] }
 0x258   :  { %2716 = vmatpush3.bf16.msra.mxu0 %v2715_v47  ;;  %v1575_v47 = vld [vmem:[%s4208_s2 + $0xf8] sm:$0xff]  ;;  %v1658_v6 = vld [vmem:[%s4208_s2 + $0x390] sm:$0xff] }
 0x259   :  { %2688 = vmatpush3.bf16.msra.mxu1 %v2687_v18  ;;  %2718 = vmatprep.subr.bf16.mxu0 %v2717_v7  ;;  %v2705_v3 = vpack.c.bf16 %v1575_v47, %v1574_v2  ;;  %v1607_v18 = vld [vmem:[%s4208_s2 + $0x1f8] sm:$0xff] }
 0x25a   :  { %2690 = vmatprep.subr.bf16.mxu1 %v2689_v48  ;;  %v2737_v19 = vpack.c.bf16 %v1607_v18, %v1606_v11  ;;  %v1591_v7 = vld [vmem:[%s4208_s2 + $0x178] sm:$0xff]  ;;  %v1657_v48 = vld [vmem:[%s4208_s2 + $0x388] sm:$0xff]  ;;  %v1610_v11 = vld [vmem:[%s4208_s2 + $0x210] sm:$0xff] }
 0x25b   :  { %v2739_v1 = vpack.c.bf16 %v1591_v7, %v1590_v24  ;;  %v2773_v44 = vpack.c.bf16 %v1657_v48, %v1656_v36  ;;  %v1659_v52 = vld [vmem:[%s4208_s2 + $0x398] sm:$0xff]  ;;  %v2745_v7 = vpack.c.bf16 %v1627_v62, %v1626_v61  ;;  %v1642_v36 = vld [vmem:[%s4208_s2 + $0x310] sm:$0xff] }
 0x25c   :  { %2720 = vmatpush3.bf16.msra.mxu0 %v2719_v20  ;;  %v1625_v20 = vld [vmem:[%s4208_s2 + $0x288] sm:$0xff]  ;;  %v1611_v18 = vld [vmem:[%s4208_s2 + $0x218] sm:$0xff]  ;;  %v1618_v61 = vld [vmem:[%s4208_s2 + $0x250] sm:$0xff] }
 0x25d   :  { %2692 = vmatpush3.bf16.msra.mxu1 %v2691_v41  ;;  %2722 = vmatprep.subr.bf16.mxu0 %v2721_v25  ;;  %v2741_v22 = vpack.c.bf16 %v1625_v20, %v1624_v0  ;;  %v1629_v0 = vld [vmem:[%s4208_s2 + $0x2a8] sm:$0xff]  ;;  %v1643_v48 = vld [vmem:[%s4208_s2 + $0x318] sm:$0xff] }
 0x25e   :  { %2694 = vmatprep.subr.bf16.mxu1 %v2693_v49  ;;  %v1619_v62 = vld [vmem:[%s4208_s2 + $0x258] sm:$0xff] }
 0x260   :  { %2724 = vmatpush3.bf16.msra.mxu0 %v2723_v60  ;;  %v1500_v60 = vlaneseq }
 0x261   :  { %2696 = vmatpush3.bf16.msra.mxu1 %v2695_v14  ;;  %2726 = vmatprep.subr.bf16.mxu0 %v2725_v4 }
 0x262   :  { %2698 = vmatprep.subr.bf16.mxu1 %v2697_v56  ;;  %vm3828_vm10 = vcmp.lt.s32.totalorder %v1500_v60, 256  ;;  %v1717_v56 = vshrl.u32 %v1500_v60, 7  ;;  %v1630_v60 = vld [vmem:[%s4208_s2 + $0x2b0] sm:$0xff] }
 0x264   :  { %2728 = vmatpush3.bf16.msra.mxu0 %v2727_v30 }
 0x265   :  { %2700 = vmatpush3.bf16.msra.mxu1 %v2699_v23  ;;  %2730 = vmatprep.subr.bf16.mxu0 %v2729_v32  ;;  %v1718_v32 = vsub.s32 %v1715_v31, %v1717_v56  ;;  %v1646_v56 = vld [vmem:[%s4208_s2 + $0x330] sm:$0xff] }
 0x266   :  { %2702 = vmatprep.subr.bf16.mxu1 %v2701_v53 }
 0x268   :  { %2732 = vmatpush3.bf16.msra.mxu0 %v2731_v35  ;;  %v1609_v35 = vld [vmem:[%s4208_s2 + $0x208] sm:$0xff] }
 0x269   :  { %2704 = vmatpush3.bf16.msra.mxu1 %v2703_v42  ;;  %2734 = vmatprep.subr.bf16.mxu0 %v2733_v51  ;;  %v1640_v42 = vld [vmem:[%s4208_s2 + $0x300] sm:$0xff]  ;;  %v1641_v51 = vld [vmem:[%s4208_s2 + $0x308] sm:$0xff]  ;;  %v2743_v47 = vpack.c.bf16 %v1609_v35, %v1608_v34  ;;  %v1635_v34 = vld [vmem:[%s4208_s2 + $0x2d8] sm:$0xff] }
 0x26a   :  { %2706 = vmatprep.subr.bf16.mxu1 %v2705_v3  ;;  %v2775_v24 = vpack.c.bf16 %v1641_v51, %v1640_v42  ;;  %v1667_v42 = vld [vmem:[%s4208_s2 + $0x3d8] sm:$0xff] }
 0x26c   :  { %2736 = vmatpush3.bf16.msra.mxu0 %v2735_v46 }
 0x26d   :  { %2708 = vmatpush3.bf16.msra.mxu1 %v2707_v43  ;;  %2738 = vmatprep.subr.bf16.mxu0 %v2737_v19 }
 0x26e   :  { %2742 = vmatprep.subr.bf16.mxu1 %v2741_v22  ;;  %v2777_v22 = vpack.c.bf16 %v1659_v52, %v1658_v6  ;;  %v1650_v6 = vld [vmem:[%s4208_s2 + $0x350] sm:$0xff]  ;;  %v1651_v52 = vld [vmem:[%s4208_s2 + $0x358] sm:$0xff] }
 0x270   :  { %2740 = vmatpush3.bf16.msra.mxu0 %v2739_v1  ;;  %v1628_v1 = vld [vmem:[%s4208_s2 + $0x2a0] sm:$0xff] }
 0x271   :  { %2774 = vmatprep.subr.bf16.mxu0 %v2773_v44  ;;  %v2747_v44 = vpack.c.bf16 %v1611_v18, %v1610_v11  ;;  %v2763_v11 = vpack.c.bf16 %v1619_v62, %v1618_v61  ;;  %v1668_v18 = vld [vmem:[%s4208_s2 + $0x3e0] sm:$0xff]  ;;  %v1681_v61 = vld [vmem:[%s4208_s2 + $0x448] sm:$0xff]  ;;  %v1698_v62 = vld [vmem:[%s4208_s2 + $0x4d0] sm:$0xff] }
 0x2fc   :  { %v1340_v41 = vpop.f32.mrb[4].mxu0 }
 0x2fd   :  { %v1341_v27 = vadd.f32 %v1340_v41, %v1269_v63  ;;  %v1342_v45 = vpop.f32.mrb[5].mxu0  ;;  %v1661_v41 = vld [vmem:[%s4208_s2 + $0x3a8] sm:$0xff] }
 0x2fe   :  { %v1343_v25 = vadd.f32 %v1342_v45, %v1269_v63  ;;  %v2749_v45 = vpack.c.bf16 %v1629_v0, %v1628_v1  ;;  %v1621_v1 = vld [vmem:[%s4208_s2 + $0x268] sm:$0xff]  ;;  %v2795_v0 = vpack.c.bf16 %v1651_v52, %v1650_v6  ;;  %v1683_v6 = vld [vmem:[%s4208_s2 + $0x458] sm:$0xff]  ;;  %v1700_v52 = vld [vmem:[%s4208_s2 + $0x4e0] sm:$0xff] }
 0x2ff   :  { %v1487_v29 = vmax.f32 %v1341_v27, 0.0 }
 0x300   :  { %v1488_v55 = vmax.f32 %v1343_v25, 0.0  ;;  %v1612_v25 = vld [vmem:[%s4208_s2 + $0x220] sm:$0xff] }
 0x301   :  { %1493 = vst [vmem:[#allocation5] sm:$0xff] %v1487_v29  ;;  %v1613_v29 = vld [vmem:[%s4208_s2 + $0x228] sm:$0xff] }
 0x302   :  { %1494 = vst [vmem:[#allocation5 + $0x8] sm:$0xff] %v1488_v55  ;;  %v2779_v55 = vpack.c.bf16 %v1643_v48, %v1642_v36  ;;  %v1652_v48 = vld [vmem:[%s4208_s2 + $0x360] sm:$0xff] }
 0x309   :  { %v1499_v58 = vld [vmem:[#allocation5] ss:$8 sm:$0x3]  ;;  %v1506_v49 = vld [vmem:[#allocation5 + $0x1] ss:$8 sm:$0x3] }
 0x30a   :  { %v1510_v59 = vld [vmem:[#allocation5 + $0x2] ss:$8 sm:$0x3]  ;;  %v1514_v5 = vld [vmem:[#allocation5 + $0x3] ss:$8 sm:$0x3] }
 0x30b   :  { %1504 = vst.msk [vmem:[#allocation6] ss:$2 sm:$0x3] %vm3828_vm10, %v1499_v58  ;;  %1508 = vst.msk [vmem:[#allocation6 + $0x4] ss:$2 sm:$0x3] %vm3828_vm10, %v1506_v49 }
 0x30c   :  { %v1518_v14 = vld [vmem:[#allocation5 + $0x4] ss:$8 sm:$0x3]  ;;  %1512 = vst.msk [vmem:[#allocation6 + $0x8] ss:$2 sm:$0x3] %vm3828_vm10, %v1510_v59 }
 0x30d   :  { %1516 = vst.msk [vmem:[#allocation6 + $0xc] ss:$2 sm:$0x3] %vm3828_vm10, %v1514_v5  ;;  %1520 = vst.msk [vmem:[#allocation6 + $0x10] ss:$2 sm:$0x3] %vm3828_vm10, %v1518_v14  ;;  %v2751_v5 = vpack.c.bf16 %v1613_v29, %v1612_v25 }
 0x30e   :  { %v1482_v17 = vpop.f32.mrb[6].mxu0  ;;  %v1644_v49 = vld [vmem:[%s4208_s2 + $0x320] sm:$0xff]  ;;  %v1645_v59 = vld [vmem:[%s4208_s2 + $0x328] sm:$0xff]  ;;  %v1662_v14 = vld [vmem:[%s4208_s2 + $0x3b0] sm:$0xff] }
 0x30f   :  { %v1483_v15 = vadd.f32 %v1482_v17, %v1269_v63  ;;  %v1484_v4 = vpop.f32.mrb[7].mxu0  ;;  %v1663_v17 = vld [vmem:[%s4208_s2 + $0x3b8] sm:$0xff]  ;;  %v1622_v25 = vld [vmem:[%s4208_s2 + $0x270] sm:$0xff] }
 0x310   :  { %v1485_v8 = vadd.f32 %v1484_v4, %v1269_v63  ;;  %v1660_v63 = vld [vmem:[%s4208_s2 + $0x3a0] sm:$0xff]  ;;  %v1614_v4 = vld [vmem:[%s4208_s2 + $0x230] sm:$0xff]  ;;  %v2785_v57 = vpack.c.bf16 %v1663_v17, %v1662_v14  ;;  %v1623_v29 = vld [vmem:[%s4208_s2 + $0x278] sm:$0xff] }
 0x311   :  { %v1491_v37 = vmax.f32 %v1483_v15, 0.0  ;;  %v2781_v58 = vpack.c.bf16 %v1661_v41, %v1660_v63  ;;  %v2753_v15 = vpack.c.bf16 %v1631_v13, %v1630_v60  ;;  %v1670_v41 = vld [vmem:[%s4208_s2 + $0x3f0] sm:$0xff]  ;;  %v1688_v60 = vld [vmem:[%s4208_s2 + $0x480] sm:$0xff]  ;;  %v1689_v13 = vld [vmem:[%s4208_s2 + $0x488] sm:$0xff] }
 0x312   :  { %v1492_v30 = vmax.f32 %v1485_v8, 0.0  ;;  %v1615_v8 = vld [vmem:[%s4208_s2 + $0x238] sm:$0xff]  ;;  %v2805_v14 = vpack.c.bf16 %v1689_v13, %v1688_v60  ;;  %v1672_v17 = vld [vmem:[%s4208_s2 + $0x400] sm:$0xff]  ;;  %v2321_v13 = vld [vmem:[%s4207_s1 + $0x50] ss:$0 sm:$0xff] }
 0x313   :  { %1497 = vst [vmem:[#allocation5 + $0x20] sm:$0xff] %v1491_v37  ;;  %v2783_v37 = vpack.c.bf16 %v1645_v59, %v1644_v49  ;;  %v1654_v49 = vld [vmem:[%s4208_s2 + $0x370] sm:$0xff]  ;;  %v1655_v59 = vld [vmem:[%s4208_s2 + $0x378] sm:$0xff] }
 0x314   :  { %1498 = vst [vmem:[#allocation5 + $0x28] sm:$0xff] %v1492_v30  ;;  %v1632_v30 = vld [vmem:[%s4208_s2 + $0x2c0] sm:$0xff] }
 0x315   :  { %v2757_v31 = vpack.c.bf16 %v1633_v9, %v1632_v30 }
 0x31b   :  { %v1522_v16 = vld [vmem:[#allocation5 + $0x20] ss:$8 sm:$0x3]  ;;  %v1526_v21 = vld [vmem:[#allocation5 + $0x21] ss:$8 sm:$0x3] }
 0x31c   :  { %v1530_v23 = vld [vmem:[#allocation5 + $0x22] ss:$8 sm:$0x3]  ;;  %v1534_v38 = vld [vmem:[#allocation5 + $0x23] ss:$8 sm:$0x3] }
 0x31d   :  { %1524 = vst.msk [vmem:[#allocation6 + $0x1] ss:$2 sm:$0x3] %vm3828_vm10, %v1522_v16  ;;  %1528 = vst.msk [vmem:[#allocation6 + $0x5] ss:$2 sm:$0x3] %vm3828_vm10, %v1526_v21  ;;  %v2755_v21 = vpack.c.bf16 %v1615_v8, %v1614_v4  ;;  %v2803_v4 = vpack.c.bf16 %v1655_v59, %v1654_v49 }
 0x31e   :  { %v1538_v10 = vld [vmem:[#allocation5 + $0x24] ss:$8 sm:$0x3]  ;;  %1532 = vst.msk [vmem:[#allocation6 + $0x9] ss:$2 sm:$0x3] %vm3828_vm10, %v1530_v23 }
 0x31f   :  { %1536 = vst.msk [vmem:[#allocation6 + $0xd] ss:$2 sm:$0x3] %vm3828_vm10, %v1534_v38  ;;  %1540 = vst.msk [vmem:[#allocation6 + $0x11] ss:$2 sm:$0x3] %vm3828_vm10, %v1538_v10 }
 0x320   :  { %v1647_v16 = vld [vmem:[%s4208_s2 + $0x338] sm:$0xff]  ;;  %v1664_v23 = vld [vmem:[%s4208_s2 + $0x3c0] sm:$0xff]  ;;  %v1665_v38 = vld [vmem:[%s4208_s2 + $0x3c8] sm:$0xff] }
 0x321   :  { %v1616_v10 = vld [vmem:[%s4208_s2 + $0x240] sm:$0xff]  ;;  %v2789_v35 = vpack.c.bf16 %v1665_v38, %v1664_v23  ;;  %v1690_v8 = vld [vmem:[%s4208_s2 + $0x490] sm:$0xff]  ;;  %v1693_v38 = vld [vmem:[%s4208_s2 + $0x4a8] sm:$0xff] }
 0x322   :  { %v1692_v23 = vld [vmem:[%s4208_s2 + $0x4a0] sm:$0xff] }
 0x323   :  { %v1411_v26 = vpop.f32.mrb[4].mxu1 }
 0x324   :  { %v1541_v33 = vld [vmem:[#allocation6] sm:$0xff]  ;;  %v1413_v53 = vpop.f32.mrb[5].mxu1  ;;  %v2787_v26 = vpack.c.bf16 %v1647_v16, %v1646_v56  ;;  %v1675_v16 = vld [vmem:[%s4208_s2 + $0x418] sm:$0xff] }
 0x325   :  { %v1719_v54 = vrot.slane %v1541_v33, %v1718_v32  ;;  %v1712_v39 = vcombine.high %v1541_v33, %v1541_v33  ;;  %v1634_v33 = vld [vmem:[%s4208_s2 + $0x2d0] sm:$0xff]  ;;  %v1648_v53 = vld [vmem:[%s4208_s2 + $0x340] sm:$0xff] }
 0x326   :  { %v1542_v40 = vld [vmem:[#allocation6 + $0x8] sm:$0xff]  ;;  %v2761_v51 = vpack.c.bf16 %v1635_v34, %v1634_v33  ;;  %v4058_v30 = vld.sshfl [vmem:[#allocation6 + $0x10] sm:$0x33 pattern:$0x76325410]  ;;  %v1674_v56 = vld [vmem:[%s4208_s2 + $0x410] sm:$0xff] }
 0x327   :  { %v3861_v50 = vrot.slane %v1542_v40, %v1718_v32  ;;  %v1729_v46 = vcombine.high %v1542_v40, %v1542_v40  ;;  %v1727_v2 = vcombine.high %v1719_v54, %v1719_v54  ;;  %v1726_v3 = vrot.slane %v1712_v39, %v1718_v32  ;;  %v1666_v40 = vld [vmem:[%s4208_s2 + $0x3d0] sm:$0xff]  ;;  %v1695_v33 = vld [vmem:[%s4208_s2 + $0x4b8] sm:$0xff] }
 0x329   :  { %v3878_v43 = vrot.slane %v1729_v46, %v1718_v32  ;;  %1828 = vmatprep.mubr.f32.mxu1 %v1727_v2  ;;  %v1728_v19 = vcombine.high %v1726_v3, %v1726_v3  ;;  %v1744_v20 = vcombine.high %v3861_v50, %v3861_v50  ;;  %v1617_v32 = vld [vmem:[%s4208_s2 + $0x248] sm:$0xff]  ;;  %v1636_v2 = vld [vmem:[%s4208_s2 + $0x2e0] sm:$0xff] }
 0x32a   :  { %1829 = vmatmul.mubr.f32.vlgmr.msra.gmra.mrb[6].mxu1 %v1719_v54  ;;  %v1649_v54 = vld [vmem:[%s4208_s2 + $0x348] sm:$0xff]  ;;  %v2759_v39 = vpack.c.bf16 %v1617_v32, %v1616_v10  ;;  %v2813_v10 = vpack.c.bf16 %v1693_v38, %v1692_v23  ;;  %v1676_v32 = vld [vmem:[%s4208_s2 + $0x420] sm:$0xff] }
 0x32b   :  { %2744 = vmatpush3.bf16.msra.mxu1 %v2743_v47  ;;  %1898 = vmatprep.mubr.f32.mxu0 %v1728_v19  ;;  %v1745_v27 = vcombine.high %v3878_v43, %v3878_v43  ;;  %v2791_v46 = vpack.c.bf16 %v1649_v54, %v1648_v53  ;;  %v1637_v47 = vld [vmem:[%s4208_s2 + $0x2e8] sm:$0xff]  ;;  %v1679_v53 = vld [vmem:[%s4208_s2 + $0x438] sm:$0xff]  ;;  %v1696_v54 = vld [vmem:[%s4208_s2 + $0x4c0] sm:$0xff] }
 0x32c   :  { %1968 = vmatprep.mubr.f32.mxu1 %v1744_v20  ;;  %1899 = vmatmul.mubr.f32.vlgmr.msra.gmra.mrb[8].mxu0 %v1726_v3  ;;  %v2793_v3 = vpack.c.bf16 %v1667_v42, %v1666_v40  ;;  %v1669_v19 = vld [vmem:[%s4208_s2 + $0x3e8] sm:$0xff]  ;;  %v1638_v20 = vld [vmem:[%s4208_s2 + $0x2f0] sm:$0xff] }
 0x32d   :  { %2776 = vmatpush3.bf16.msra.mxu0 %v2775_v24  ;;  %2746 = vmatprep.subr.bf16.mxu1 %v2745_v7  ;;  %v2765_v24 = vpack.c.bf16 %v1637_v47, %v1636_v2  ;;  %v1620_v7 = vld [vmem:[%s4208_s2 + $0x260] sm:$0xff]  ;;  %v2797_v36 = vpack.c.bf16 %v1669_v19, %v1668_v18 }
 0x32e   :  { %2038 = vmatprep.mubr.f32.mxu0 %v1745_v27  ;;  %2778 = vmatprep.subr.bf16.mxu0 %v2777_v22  ;;  %v1639_v22 = vld [vmem:[%s4208_s2 + $0x2f8] sm:$0xff]  ;;  %v2767_v63 = vpack.c.bf16 %v1621_v1, %v1620_v7  ;;  %v1685_v7 = vld [vmem:[%s4208_s2 + $0x468] sm:$0xff]  ;;  %v1702_v1 = vld [vmem:[%s4208_s2 + $0x4f0] sm:$0xff] }
 0x32f   :  { %2748 = vmatpush3.bf16.msra.mxu1 %v2747_v44  ;;  %v1653_v44 = vld [vmem:[%s4208_s2 + $0x368] sm:$0xff]  ;;  %v1671_v27 = vld [vmem:[%s4208_s2 + $0x3f8] sm:$0xff] }
 0x330   :  { %2750 = vmatprep.subr.bf16.mxu1 %v2749_v45  ;;  %v2769_v45 = vpack.c.bf16 %v1639_v22, %v1638_v20 }
 0x331   :  { %2780 = vmatpush3.bf16.msra.mxu0 %v2779_v55  ;;  %v2799_v55 = vpack.c.bf16 %v1653_v44, %v1652_v48  ;;  %v1687_v48 = vld [vmem:[%s4208_s2 + $0x478] sm:$0xff] }
 0x332   :  { %2782 = vmatprep.subr.bf16.mxu0 %v2781_v58  ;;  %v2801_v58 = vpack.c.bf16 %v1671_v27, %v1670_v41  ;;  %v2121_v41 = vld [vmem:[%s4207_s1 + $0x18] sm:$0xff]  ;;  %v2122_v27 = vld [vmem:[%s4207_s1 + $0x20] sm:$0xff] }
 0x333   :  { %2752 = vmatpush3.bf16.msra.mxu1 %v2751_v5  ;;  %v2771_v5 = vpack.c.bf16 %v1623_v29, %v1622_v25  ;;  %v2123_v25 = vld [vmem:[%s4207_s1 + $0x28] sm:$0x3f] }
 0x334   :  { %2754 = vmatprep.subr.bf16.mxu1 %v2753_v15  ;;  %v1673_v15 = vld [vmem:[%s4208_s2 + $0x408] sm:$0xff]  ;;  %v2841_v29 = vpack.c.bf16 %v2123_v25, %v2122_v27 }
 0x335   :  { %2784 = vmatpush3.bf16.msra.mxu0 %v2783_v37  ;;  %v1691_v37 = vld [vmem:[%s4208_s2 + $0x498] sm:$0xff]  ;;  %v2807_v9 = vpack.c.bf16 %v1673_v15, %v1672_v17 }
 0x336   :  { %2786 = vmatprep.subr.bf16.mxu0 %v2785_v57  ;;  %v2809_v57 = vpack.c.bf16 %v1691_v37, %v1690_v8 }
 0x337   :  { %2756 = vmatpush3.bf16.msra.mxu1 %v2755_v21  ;;  %v1753_v21 = vcombine.high %v4058_v30, %v4058_v30 }
 0x338   :  { %2758 = vmatprep.subr.bf16.mxu1 %v2757_v31  ;;  %v2811_v31 = vpack.c.bf16 %v1675_v16, %v1674_v56 }
 0x339   :  { %2788 = vmatpush3.bf16.msra.mxu0 %v2787_v26  ;;  %v1677_v26 = vld [vmem:[%s4208_s2 + $0x428] sm:$0xff] }
 0x33a   :  { %2790 = vmatprep.subr.bf16.mxu0 %v2789_v35  ;;  %v1678_v35 = vld [vmem:[%s4208_s2 + $0x430] sm:$0xff] }
 0x33b   :  { %2760 = vmatpush3.bf16.msra.mxu1 %v2759_v39  ;;  %v1697_v39 = vld [vmem:[%s4208_s2 + $0x4c8] sm:$0xff]  ;;  %v2819_v40 = vpack.c.bf16 %v1679_v53, %v1678_v35  ;;  %v2215_v53 = vld [vmem:[%s4207_s1 + $0x40] sm:$0xff] }
 0x33c   :  { %2762 = vmatprep.subr.bf16.mxu1 %v2761_v51  ;;  %v2821_v42 = vpack.c.bf16 %v1697_v39, %v1696_v54  ;;  %v1680_v51 = vld [vmem:[%s4208_s2 + $0x440] sm:$0xff]  ;;  %v2324_v39 = vld [vmem:[%s4207_s1 + $0x58] ss:$0 sm:$0xff] }
 0x33d   :  { %2792 = vmatpush3.bf16.msra.mxu0 %v2791_v46  ;;  %v1699_v46 = vld [vmem:[%s4208_s2 + $0x4d8] sm:$0xff]  ;;  %v2823_v2 = vpack.c.bf16 %v1681_v61, %v1680_v51 }
 0x33e   :  { %2794 = vmatprep.subr.bf16.mxu0 %v2793_v3  ;;  %v2825_v47 = vpack.c.bf16 %v1699_v46, %v1698_v62  ;;  %v1682_v3 = vld [vmem:[%s4208_s2 + $0x450] sm:$0xff] }
 0x33f   :  { %2764 = vmatpush3.bf16.msra.mxu1 %v2763_v11  ;;  %v1701_v11 = vld [vmem:[%s4208_s2 + $0x4e8] sm:$0xff]  ;;  %v2827_v18 = vpack.c.bf16 %v1683_v6, %v1682_v3 }
 0x340   :  { %2766 = vmatprep.subr.bf16.mxu1 %v2765_v24  ;;  %v2829_v19 = vpack.c.bf16 %v1701_v11, %v1700_v52  ;;  %v1684_v24 = vld [vmem:[%s4208_s2 + $0x460] sm:$0xff] }
 0x341   :  { %2796 = vmatpush3.bf16.msra.mxu0 %v2795_v0  ;;  %v1703_v0 = vld [vmem:[%s4208_s2 + $0x4f8] sm:$0xff]  ;;  %v2831_v20 = vpack.c.bf16 %v1685_v7, %v1684_v24 }
 0x342   :  { %2798 = vmatprep.subr.bf16.mxu0 %v2797_v36  ;;  %v2833_v22 = vpack.c.bf16 %v1703_v0, %v1702_v1  ;;  %v1686_v36 = vld [vmem:[%s4208_s2 + $0x470] sm:$0xff] }
 0x343   :  { %2768 = vmatpush3.bf16.msra.mxu1 %v2767_v63  ;;  %v2835_v44 = vpack.c.bf16 %v1687_v48, %v1686_v36  ;;  %v2120_v63 = vld [vmem:[%s4207_s1 + $0x10] sm:$0xff] }
 0x344   :  { %2770 = vmatprep.subr.bf16.mxu1 %v2769_v45  ;;  %v2838_v45 = vpack.c.bf16 %v2121_v41, %v2120_v63 }
 0x345   :  { %2800 = vmatpush3.bf16.msra.mxu0 %v2799_v55 }
 0x346   :  { %2802 = vmatprep.subr.bf16.mxu0 %v2801_v58 }
 0x347   :  { %2772 = vmatpush3.bf16.msra.mxu1 %v2771_v5 }
 0x348   :  { %2806 = vmatprep.subr.bf16.mxu1 %v2805_v14 }
 0x349   :  { %2804 = vmatpush3.bf16.msra.mxu0 %v2803_v4 }
 0x34a   :  { %1969 = vmatmul.mubr.f32.vlgmr.msra.gmra.mrb[8].mxu1 %v3861_v50  ;;  %2837 = vmatprep.subr.bf16.mxu0 %v3123_v28  ;;  %v1694_v50 = vld [vmem:[%s4208_s2 + $0x4b0] sm:$0xff] }
 0x34b   :  { %2808 = vmatpush3.bf16.msra.mxu1 %v2807_v9  ;;  %2108 = vmatprep.mubr.f32.mxu1 %v1753_v21  ;;  %v2817_v34 = vpack.c.bf16 %v1695_v33, %v1694_v50 }
 0x34c   :  { %2039 = vmatmul.mubr.f32.vlgmr.msra.gmra.mrb[10].mxu0 %v3878_v43  ;;  %2810 = vmatprep.subr.bf16.mxu1 %v2809_v57  ;;  %v2815_v43 = vpack.c.bf16 %v1677_v26, %v1676_v32 }
 0x34d   :  { %2555 = vmatprep.mubr.msk.f32.mxu0 %vm3124_vm9, %v3120_v12  ;;  %2839 = vmatpush3.bf16.msra.mxu0 %v2838_v45 }
 0x34e   :  { %2840 = vmatprep.subr.bf16.mxu0 %v3123_v28 }
 0x34f   :  { %2812 = vmatpush3.bf16.msra.mxu1 %v2811_v31 }
 0x350   :  { %2814 = vmatprep.subr.bf16.mxu1 %v2813_v10 }
 0x351   :  { %2843 = vmatpush3.bf16.msk.msra.mxu0 %vm4159_vm13, %v2841_v29 }
 0x352   :  { %2844 = vmatprep.subr.bf16.mxu0 %v3123_v28 }
 0x353   :  { %2816 = vmatpush3.bf16.msra.mxu1 %v2815_v43  ;;  %v2213_v43 = vld [vmem:[%s4207_s1 + $0x30] sm:$0xff] }
 0x354   :  { %2818 = vmatprep.subr.bf16.mxu1 %v2817_v34  ;;  %v2214_v34 = vld [vmem:[%s4207_s1 + $0x38] sm:$0xff] }
 0x355   :  { %v2845_v35 = vpack.c.bf16 %v2214_v34, %v2213_v43 }
 0x357   :  { %2820 = vmatpush3.bf16.msra.mxu1 %v2819_v40 }
 0x358   :  { %2822 = vmatprep.subr.bf16.mxu1 %v2821_v42 }
 0x35b   :  { %2824 = vmatpush3.bf16.msra.mxu1 %v2823_v2 }
 0x35c   :  { %2826 = vmatprep.subr.bf16.mxu1 %v2825_v47  ;;  %v2328_v47 = vld [vmem:[%s4207_s1 + $0x60] ss:$0 sm:$0xff] }
 0x35f   :  { %2828 = vmatpush3.bf16.msra.mxu1 %v2827_v18 }
 0x360   :  { %2830 = vmatprep.subr.bf16.mxu1 %v2829_v19 }
 0x363   :  { %2832 = vmatpush3.bf16.msra.mxu1 %v2831_v20 }
 0x364   :  { %2834 = vmatprep.subr.bf16.mxu1 %v2833_v22 }
 0x367   :  { %2836 = vmatpush3.bf16.msra.mxu1 %v2835_v44 }
 0x36a   :  { %2109 = vmatmul.mubr.f32.vlgmr.msra.gmra.mrb[10].mxu1 %v4058_v30 }
 0x3fd   :  { %v2373_v60 = vpop.f32.mrb[6].mxu1 }
 0x3fe   :  { %v2374_v58 = vpop.f32.mrb[7].mxu1 }
 0x3ff   :  { %v2375_v49 = vadd.f32 %v2374_v58, %v2373_v60  ;;  %v2408_v59 = vpop.f32.mrb[8].mxu0 }
 0x400   :  { %v2409_v5 = vpop.f32.mrb[9].mxu0 }
 0x401   :  { %v1831_v14 = vadd.f32 %v2375_v49, %v2321_v13  ;;  %v2410_v17 = vadd.f32 %v2409_v5, %v2408_v59 }
 0x403   :  { %v1901_v15 = vadd.f32 %v2410_v17, %v1831_v14 }
 0x41d   :  { %v2443_v4 = vpop.f32.mrb[8].mxu1 }
 0x41e   :  { %v2444_v8 = vpop.f32.mrb[9].mxu1 }
 0x41f   :  { %v2445_v37 = vadd.f32 %v2444_v8, %v2443_v4  ;;  %v2478_v30 = vpop.f32.mrb[10].mxu0 }
 0x420   :  { %v2479_v9 = vpop.f32.mrb[11].mxu0 }
 0x421   :  { %v1971_v57 = vadd.f32 %v2445_v37, %v1901_v15  ;;  %v2480_v56 = vadd.f32 %v2479_v9, %v2478_v30 }
 0x423   :  { %v2041_v16 = vadd.f32 %v2480_v56, %v1971_v57 }
 0x43d   :  { %v2513_v21 = vpop.f32.mrb[10].mxu1 }
 0x43e   :  { %v2514_v23 = vpop.f32.mrb[11].mxu1 }
 0x43f   :  { %v2515_v38 = vadd.f32 %v2514_v23, %v2513_v21 }
 0x441   :  { %v2111_v31 = vadd.f32 %v2515_v38, %v2041_v16 }
 0x443   :  { %v2115_v10 = vmin.f32 %v2111_v31, 0.0  ;;  %vm2114_vm15 = vcmp.gt.f32.partialorder %v2111_v31, 0.0 }
 0x445   :  { %v2116_v32 = vmul.f32 1.442695, %v2115_v10 }
 0x447   :  { %3085 = vpow2.f32 %v2116_v32 }
 0x451   :  { %v3086_v26 = vpop.eup %3085 }
 0x452   :  { %v2323_v50 = vadd.f32 -1.0, %v3086_v26 }
 0x454   :  { %v2119_v33 = vsel %vm2114_vm15, %v2111_v31, %v2323_v50 }
 0x455   :  { %2556 = vmatmul.mubr.msk.f32.vlgmr.msra.gmra.mrb[12].mxu0 %vm2129_vm14, %v2119_v33 }
 0x456   :  { %2566 = vmatprep.mubr.msk.f32.mxu0 %vm3124_vm9, %v3120_v12  ;;  %2846 = vmatpush3.bf16.msra.mxu0 %v2845_v35  ;;  %v2216_v12 = vld [vmem:[%s4207_s1 + $0x48] sm:$0x3f] }
 0x457   :  { %2847 = vmatprep.subr.bf16.mxu0 %v3123_v28  ;;  %v2848_v54 = vpack.c.bf16 %v2216_v12, %v2215_v53 }
 0x45a   :  { %2850 = vmatpush3.bf16.msk.msra.mxu0 %vm4159_vm13, %v2848_v54 }
 0x528   :  { %v2203_v40 = vpop.f32.mrb[12].mxu0 }
 0x529   :  { %v2204_v42 = vadd.f32 %v2324_v39, %v2203_v40  ;;  %v2557_v51 = vpop.f32.mrb[13].mxu0 }
 0x52b   :  { %v2208_v28 = vmin.f32 %v2204_v42, 0.0  ;;  %vm2207_vm0 = vcmp.gt.f32.partialorder %v2204_v42, 0.0 }
 0x52d   :  { %v2209_v61 = vmul.f32 1.442695, %v2208_v28 }
 0x52f   :  { %3087 = vpow2.f32 %v2209_v61 }
 0x539   :  { %v3088_v62 = vpop.eup %3087 }
 0x53a   :  { %v2327_v46 = vadd.f32 -1.0, %v3088_v62 }
 0x53c   :  { %v2212_v2 = vsel %vm2207_vm0, %v2204_v42, %v2327_v46 }
 0x53d   :  { %2567 = vmatmul.mubr.msk.f32.vlgmr.msra.gmra.mrb[14].mxu0 %vm2129_vm14, %v2212_v2 }
 0x610   :  { %v2294_v3 = vpop.f32.mrb[14].mxu0 }
 0x611   :  { %v2295_v6 = vadd.f32 %v2328_v47, %v2294_v3  ;;  %v2568_v52 = vpop.f32.mrb[15].mxu0 }
 0x613   :  { %2299 = vst.msk [vmem:[#allocation7] sm:$0x3] %vm2298_vm1, %v2295_v6 }
 0x614   :  { %3100 = shalt.err (!%p3097_p4)
}
 0x615   :  { %s3101_s22 = scalar_lea.hbm %s4209_s3, 32 }
 0x616   :  { %p3102_p5 = scmp.ne.s32.totalorder %s4209_s3, %s3101_s22  ;;  %p3105_p6 = scmp.lt.u32.totalorder %s3101_s22, %s4209_s3 }
 0x618   :  { %p3107_p7 = pnand %p3105_p6, %p3102_p5 }
 0x61a   :  { %3110 = shalt.err (!%p3107_p7)
}
 0x61b   :  { %2309 = dma.vmem_to_hbm [thread:$0]  %s2307_s18, 32, %s4209_s3, [#allocation8]  }
 0x61c   :  { %3111 = dma.done.wait [#allocation8], 32  }
 0x61d   :  { %3112 = vsyncadd [#allocation8], 4294967264 }
 0x61e   :  { %2313 = vsyncpa [#allocation8], 1 }

</bundles_post_ra>
